<compile_context>
chip_gen: v6e
topology: v6e:2x2x1
jax: 0.10.0
libtpu: 0.0.40
codegen_flags: <defaults>
</compile_context>

<pallas_src>
import jax
import jax.numpy as jnp
from jax.experimental import pallas as pl
from jax.experimental.pallas import tpu as pltpu


def flow_pair_kernel(x_ref, w1_ref, b1_ref, ws2_ref, bs2_ref, wt2_ref, bt2_ref,
                     z_ref, ld_ref):
    """One grid step = two coupling flows (even parity then odd parity).

    Weight refs carry a leading pair axis of size 2: index 0 is the even flow,
    index 1 is the odd flow.  z_ref / ld_ref are resident across the flow axis.
    """
    k = pl.program_id(1)

    @pl.when(k == 0)
    def _init():
        z_ref[...] = x_ref[...]
        ld_ref[...] = jnp.zeros_like(ld_ref)

    x = z_ref[...]
    dh = x.shape[1] // 2

    def coupling(cond, other, w1, b1, ws2, bs2, wt2, bt2):
        # h       = tanh(cond @ [Ws1|Wt1] + [bs1|bt1])      (tm, 2H), f32 accum
        # s       = h[:, :H] @ Ws2 + bs2                    (tm, dh)
        # t       = h[:, H:] @ Wt2 + bt2                    (tm, dh)
        cdt = w1.dtype                  # compute dtype (f32 or bf16)
        hdim = w1.shape[1] // 2
        h = jnp.tanh(jnp.dot(cond.astype(cdt), w1,
                             preferred_element_type=jnp.float32) + b1)
        s = jnp.dot(h[:, :hdim].astype(cdt), ws2,
                    preferred_element_type=jnp.float32) + bs2
        t = jnp.dot(h[:, hdim:].astype(cdt), wt2,
                    preferred_element_type=jnp.float32) + bt2
        transformed = jnp.exp(s) * other + t
        ld = jnp.sum(s, axis=1, keepdims=True)
        return transformed, ld

    x0 = x[:, :dh]
    x1 = x[:, dh:]

    # Flow 2k (even parity): condition on first half, transform second half.
    z1, ld_e = coupling(x0, x1, w1_ref[0], b1_ref[0], ws2_ref[0], bs2_ref[0],
                        wt2_ref[0], bt2_ref[0])
    # State after the even flow is [x0 | z1].

    # Flow 2k+1 (odd parity): condition on second half (z1), transform first.
    z0, ld_o = coupling(z1, x0, w1_ref[1], b1_ref[1], ws2_ref[1], bs2_ref[1],
                        wt2_ref[1], bt2_ref[1])

    # Write output halves directly (no concat / select).
    z_ref[:, :dh] = z0
    z_ref[:, dh:] = z1
    ld_ref[...] = ld_ref[...] + ld_e + ld_o


def _pick_batch_tile(m, d):
    """Default batch tile: large (targets 512, >=2 tiles when possible), a
    multiple of 8 dividing m, capped so f32 state double-buffers stay ~<=16MiB."""
    if m % 8 != 0:
        return m  # full-batch block (full array dims are always legal)
    vmem_cap = max(8, (((16 << 20) // (16 * d)) // 8) * 8)
    target = min(512, max(8, m // 2), vmem_cap, m)
    t = (target // 8) * 8
    while t >= 8:
        if m % t == 0:
            return t
        t -= 8
    return m


def normalizing_flow_forward(x, fused, *, batch_tile=None):
    """fused: dict of pair-stacked per-flow weights (see fuse_params).
    Returns (z, log_det) in float32."""
    m, d = x.shape
    n_flows = fused["w1"].shape[0]
    dh = d // 2
    hidden = fused["w1"].shape[-1] // 2

    # TODO(synk): odd flow counts would need a tail step; nnest builds the
    # alternating even/odd-parity coupling flows in pairs.
    assert n_flows % 2 == 0, "kernel unrolls flows in even/odd pairs"
    assert d % 2 == 0 and dh % 128 == 0, "half-width dh must be a multiple of 128"
    assert hidden % 128 == 0, "hidden width must be a multiple of 128"
    n_pairs = n_flows // 2

    tm = _pick_batch_tile(m, d) if batch_tile is None else batch_tile
    assert m % tm == 0, "batch_tile must divide the batch"
    assert tm % 8 == 0 or tm == m, "batch_tile must be a multiple of 8"

    state_spec = pl.BlockSpec((tm, d), lambda i, k: (i, 0))
    ld_spec = pl.BlockSpec((tm, 1), lambda i, k: (i, 0))

    def wspec(shape):
        # select the (even, odd) weight pair for this grid step; batch axis ignored
        return pl.BlockSpec((2,) + shape, lambda i, k: (k,) + (0,) * len(shape))

    z, ld = pl.pallas_call(
        flow_pair_kernel,
        out_shape=(jax.ShapeDtypeStruct((m, d), jnp.float32),
                   jax.ShapeDtypeStruct((m, 1), jnp.float32)),
        grid_spec=pltpu.PrefetchScalarGridSpec(
            num_scalar_prefetch=0,
            grid=(m // tm, n_pairs),
            in_specs=[
                state_spec,                   # x (only consumed at k == 0)
                wspec((dh, 2 * hidden)),      # w1  : (F, dh, 2H)   [Ws1|Wt1]
                wspec((1, 2 * hidden)),       # b1  : (F, 1, 2H)    f32
                wspec((hidden, dh)),          # ws2 : (F, H, dh)
                wspec((1, dh)),               # bs2 : (F, 1, dh)    f32
                wspec((hidden, dh)),          # wt2 : (F, H, dh)
                wspec((1, dh)),               # bt2 : (F, 1, dh)    f32
            ],
            out_specs=[state_spec, ld_spec],
        ),
        compiler_params=pltpu.CompilerParams(
            dimension_semantics=("parallel", "arbitrary")),
    )(x, fused["w1"], fused["b1"], fused["ws2"], fused["bs2"],
      fused["wt2"], fused["bt2"])

    return z, ld.reshape(m)


def fuse_params(params, compute_dtype=jnp.float32):
    """Host-side prep (done once): fuse the first-layer s/t weights and cast
    the big weight matrices to the compute dtype.  Biases stay float32."""
    w1 = jnp.concatenate([params["ws1"], params["wt1"]], axis=2)   # (F, dh, 2H)
    b1 = jnp.concatenate([params["bs1"], params["bt1"]], axis=2)   # (F, 1, 2H)
    return {
        "w1": w1.astype(compute_dtype),
        "b1": b1.astype(jnp.float32),
        "ws2": params["ws2"].astype(compute_dtype),                # (F, H, dh)
        "bs2": params["bs2"].astype(jnp.float32),                  # (F, 1, dh)
        "wt2": params["wt2"].astype(compute_dtype),                # (F, H, dh)
        "bt2": params["bt2"].astype(jnp.float32),                  # (F, 1, dh)
    }


def reference_forward(x, params, compute_dtype=jnp.float32):
    """Pure-JAX reference matching the PyTorch NormalizingFlow semantics.
    With compute_dtype=bfloat16 it mimics the kernel's mixed precision
    (bf16 matmul inputs, f32 accumulation/biases/epilogue)."""
    m, d = x.shape
    dh = d // 2
    n_flows = params["ws1"].shape[0]
    hi = jax.lax.Precision.HIGHEST
    cdt = compute_dtype
    log_det = jnp.zeros((m,), jnp.float32)
    for k in range(n_flows):
        parity = k % 2
        xk = x
        if parity:
            xk = jnp.concatenate([xk[:, dh:], xk[:, :dh]], axis=1)
        x0, x1 = xk[:, :dh], xk[:, dh:]
        ws1 = params["ws1"][k].astype(cdt)
        wt1 = params["wt1"][k].astype(cdt)
        ws2 = params["ws2"][k].astype(cdt)
        wt2 = params["wt2"][k].astype(cdt)
        hs = jnp.tanh(jnp.dot(x0.astype(cdt), ws1, precision=hi,
                              preferred_element_type=jnp.float32)
                      + params["bs1"][k][0])
        s = jnp.dot(hs.astype(cdt), ws2, precision=hi,
                    preferred_element_type=jnp.float32) + params["bs2"][k][0]
        ht = jnp.tanh(jnp.dot(x0.astype(cdt), wt1, precision=hi,
                              preferred_element_type=jnp.float32)
                      + params["bt1"][k][0])
        t = jnp.dot(ht.astype(cdt), wt2, precision=hi,
                    preferred_element_type=jnp.float32) + params["bt2"][k][0]
        z1 = jnp.exp(s) * x1 + t
        z = jnp.concatenate([x0, z1], axis=1)
        if parity:
            z = jnp.concatenate([z[:, dh:], z[:, :dh]], axis=1)
        log_det = log_det + jnp.sum(s, axis=1)
        x = z
    return x, log_det


def make_params(key, n_flows, d, hidden):
    dh = d // 2
    keys = jax.random.split(key, 8)
    scale = 0.05
    return {
        "ws1": scale * jax.random.normal(keys[0], (n_flows, dh, hidden), jnp.float32),
        "bs1": scale * jax.random.normal(keys[1], (n_flows, 1, hidden), jnp.float32),
        "ws2": scale * jax.random.normal(keys[2], (n_flows, hidden, dh), jnp.float32),
        "bs2": scale * jax.random.normal(keys[3], (n_flows, 1, dh), jnp.float32),
        "wt1": scale * jax.random.normal(keys[4], (n_flows, dh, hidden), jnp.float32),
        "bt1": scale * jax.random.normal(keys[5], (n_flows, 1, hidden), jnp.float32),
        "wt2": scale * jax.random.normal(keys[6], (n_flows, hidden, dh), jnp.float32),
        "bt2": scale * jax.random.normal(keys[7], (n_flows, 1, dh), jnp.float32),
    }


if __name__ == "__main__":
    # Lane-aligned small shapes: dh = hidden = 128, batch = 256 (so the default
    # tile picker yields 2 batch tiles of 128 -> exercises the multi-tile path
    # and feeds both TensorCores on v7x), 4 alternating-parity coupling flows.
    m, d, hidden, n_flows = 256, 256, 128, 4

    key = jax.random.PRNGKey(0)
    kx, kp = jax.random.split(key)
    x = jax.random.normal(kx, (m, d), jnp.float32)
    params = make_params(kp, n_flows, d, hidden)

    # --- Exact f32 path: validate against the HIGHEST-precision reference. ---
    fused_f32 = fuse_params(params, jnp.float32)
    z32, ld32 = normalizing_flow_forward(x, fused_f32)
    z32 = jax.block_until_ready(z32)
    ld32 = jax.block_until_ready(ld32)
    z_ref, ld_ref = reference_forward(x, params, jnp.float32)
    assert z32.shape == (m, d) and ld32.shape == (m,)
    assert jnp.allclose(z32, z_ref, atol=2e-3, rtol=2e-3), \
        float(jnp.max(jnp.abs(z32 - z_ref)))
    assert jnp.allclose(ld32, ld_ref, atol=2e-3, rtol=2e-3), \
        float(jnp.max(jnp.abs(ld32 - ld_ref)))

    # --- bf16 compute path (perf-recommended on v6e/v7x): validate against a
    #     reference using the identical mixed precision. ---
    fused_bf16 = fuse_params(params, jnp.bfloat16)
    zbf, ldbf = normalizing_flow_forward(x, fused_bf16)
    zbf = jax.block_until_ready(zbf)
    ldbf = jax.block_until_ready(ldbf)
    z_ref_bf, ld_ref_bf = reference_forward(x, params, jnp.bfloat16)
    assert jnp.allclose(zbf, z_ref_bf, atol=1e-2, rtol=1e-2), \
        float(jnp.max(jnp.abs(zbf - z_ref_bf)))
    assert jnp.allclose(ldbf, ld_ref_bf, atol=2e-2, rtol=2e-2), \
        float(jnp.max(jnp.abs(ldbf - ld_ref_bf)))

    print("KERNEL_OK")
</pallas_src>

<mosaic_0001>
module attributes {stable_mosaic.version = 11 : i64} {
  func.func @flow_pair_kernel(%arg0: i32, %arg1: i32, %arg2: memref<128x256xf32, #tpu.memory_space<vmem>>, %arg3: memref<2x128x256xf32, #tpu.memory_space<vmem>>, %arg4: memref<2x1x256xf32, #tpu.memory_space<vmem>>, %arg5: memref<2x128x128xf32, #tpu.memory_space<vmem>>, %arg6: memref<2x1x128xf32, #tpu.memory_space<vmem>>, %arg7: memref<2x128x128xf32, #tpu.memory_space<vmem>>, %arg8: memref<2x1x128xf32, #tpu.memory_space<vmem>>, %arg9: memref<128x256xf32, #tpu.memory_space<vmem>>, %arg10: memref<128x1xf32, #tpu.memory_space<vmem>>) attributes {dimension_semantics = [#tpu.dimension_semantics<parallel>, #tpu.dimension_semantics<arbitrary>], iteration_bounds = array<i64: 2, 2>, scalar_prefetch = 0 : i64, scratch_operands = 0 : i64, tpu.core_type = #tpu.core_type<tc>, window_params = [{transform_indices = @transform_0, window_bounds = array<i64: 128, 256>}, {transform_indices = @transform_1, window_bounds = array<i64: 2, 128, 256>}, {transform_indices = @transform_2, window_bounds = array<i64: 2, 1, 256>}, {transform_indices = @transform_3, window_bounds = array<i64: 2, 128, 128>}, {transform_indices = @transform_4, window_bounds = array<i64: 2, 1, 128>}, {transform_indices = @transform_5, window_bounds = array<i64: 2, 128, 128>}, {transform_indices = @transform_6, window_bounds = array<i64: 2, 1, 128>}, {transform_indices = @transform_7, window_bounds = array<i64: 128, 256>}, {transform_indices = @transform_8, window_bounds = array<i64: 128, 1>}]} {
    %c0_i32 = arith.constant 0 : i32
    %0 = arith.cmpi eq, %arg1, %c0_i32 : i32
    %1 = arith.extui %0 : i1 to i32
    %c0_i32_0 = arith.constant 0 : i32
    %2 = arith.cmpi ne, %1, %c0_i32_0 : i32
    scf.if %2 {
      %c0_51 = arith.constant 0 : index
      %c0_52 = arith.constant 0 : index
      %70 = vector.load %arg2[%c0_51, %c0_52] : memref<128x256xf32, #tpu.memory_space<vmem>>, vector<128x256xf32>
      %c0_53 = arith.constant 0 : index
      %c0_54 = arith.constant 0 : index
      %71 = vector.load %arg9[%c0_53, %c0_54] : memref<128x256xf32, #tpu.memory_space<vmem>>, vector<128x256xf32>
      tpu.vector_store %arg9[%c0_53, %c0_54], %70 {strides = array<i32>} : memref<128x256xf32, #tpu.memory_space<vmem>>, vector<128x256xf32>,
      %cst_55 = arith.constant 0.000000e+00 : f32
      %72 = vector.broadcast %cst_55 : f32 to vector<128x1xf32>
      %c0_56 = arith.constant 0 : index
      %c0_57 = arith.constant 0 : index
      %73 = vector.load %arg10[%c0_56, %c0_57] : memref<128x1xf32, #tpu.memory_space<vmem>>, vector<128x1xf32>
      tpu.vector_store %arg10[%c0_56, %c0_57], %72 {strides = array<i32>} : memref<128x1xf32, #tpu.memory_space<vmem>>, vector<128x1xf32>,
    } else {
    }
    %c0 = arith.constant 0 : index
    %c0_1 = arith.constant 0 : index
    %3 = vector.load %arg9[%c0, %c0_1] : memref<128x256xf32, #tpu.memory_space<vmem>>, vector<128x256xf32>
    %4 = vector.extract_strided_slice %3 {offsets = [0, 0], sizes = [128, 128], strides = [1, 1]} : vector<128x256xf32> to vector<128x128xf32>
    %5 = vector.extract_strided_slice %3 {offsets = [0, 128], sizes = [128, 128], strides = [1, 1]} : vector<128x256xf32> to vector<128x128xf32>
    %c0_2 = arith.constant 0 : index
    %c0_3 = arith.constant 0 : index
    %c0_4 = arith.constant 0 : index
    %6 = vector.load %arg3[%c0_2, %c0_3, %c0_4] : memref<2x128x256xf32, #tpu.memory_space<vmem>>, vector<1x128x256xf32>
    %7 = vector.shape_cast %6 : vector<1x128x256xf32> to vector<128x256xf32>
    %c0_5 = arith.constant 0 : index
    %c0_6 = arith.constant 0 : index
    %c0_7 = arith.constant 0 : index
    %8 = vector.load %arg4[%c0_5, %c0_6, %c0_7] : memref<2x1x256xf32, #tpu.memory_space<vmem>>, vector<1x1x256xf32>
    %9 = vector.shape_cast %8 : vector<1x1x256xf32> to vector<1x256xf32>
    %c0_8 = arith.constant 0 : index
    %c0_9 = arith.constant 0 : index
    %c0_10 = arith.constant 0 : index
    %10 = vector.load %arg5[%c0_8, %c0_9, %c0_10] : memref<2x128x128xf32, #tpu.memory_space<vmem>>, vector<1x128x128xf32>
    %11 = vector.shape_cast %10 : vector<1x128x128xf32> to vector<128x128xf32>
    %c0_11 = arith.constant 0 : index
    %c0_12 = arith.constant 0 : index
    %c0_13 = arith.constant 0 : index
    %12 = vector.load %arg6[%c0_11, %c0_12, %c0_13] : memref<2x1x128xf32, #tpu.memory_space<vmem>>, vector<1x1x128xf32>
    %13 = vector.shape_cast %12 : vector<1x1x128xf32> to vector<1x128xf32>
    %c0_14 = arith.constant 0 : index
    %c0_15 = arith.constant 0 : index
    %c0_16 = arith.constant 0 : index
    %14 = vector.load %arg7[%c0_14, %c0_15, %c0_16] : memref<2x128x128xf32, #tpu.memory_space<vmem>>, vector<1x128x128xf32>
    %15 = vector.shape_cast %14 : vector<1x128x128xf32> to vector<128x128xf32>
    %c0_17 = arith.constant 0 : index
    %c0_18 = arith.constant 0 : index
    %c0_19 = arith.constant 0 : index
    %16 = vector.load %arg8[%c0_17, %c0_18, %c0_19] : memref<2x1x128xf32, #tpu.memory_space<vmem>>, vector<1x1x128xf32>
    %17 = vector.shape_cast %16 : vector<1x1x128xf32> to vector<1x128xf32>
    %cst = arith.constant dense<0.000000e+00> : vector<128x256xf32>
    %18 = tpu.matmul %4, %7, %cst {dimension_numbers = #tpu.dot_dimension_numbers<[1], [0], [0], [1], [0, 0, 1, 1], [], []>} : vector<128x128xf32>, vector<128x256xf32>, vector<128x256xf32> -> vector<128x256xf32>
    %19 = vector.broadcast %9 : vector<1x256xf32> to vector<128x256xf32>
    %20 = arith.addf %18, %19 : vector<128x256xf32>
    %21 = math.tanh %20 : vector<128x256xf32>
    %22 = vector.extract_strided_slice %21 {offsets = [0, 0], sizes = [128, 128], strides = [1, 1]} : vector<128x256xf32> to vector<128x128xf32>
    %cst_20 = arith.constant dense<0.000000e+00> : vector<128x128xf32>
    %23 = tpu.matmul %22, %11, %cst_20 {dimension_numbers = #tpu.dot_dimension_numbers<[1], [0], [0], [1], [0, 0, 1, 1], [], []>} : vector<128x128xf32>, vector<128x128xf32>, vector<128x128xf32> -> vector<128x128xf32>
    %24 = vector.broadcast %13 : vector<1x128xf32> to vector<128x128xf32>
    %25 = arith.addf %23, %24 : vector<128x128xf32>
    %26 = vector.extract_strided_slice %21 {offsets = [0, 128], sizes = [128, 128], strides = [1, 1]} : vector<128x256xf32> to vector<128x128xf32>
    %cst_21 = arith.constant dense<0.000000e+00> : vector<128x128xf32>
    %27 = tpu.matmul %26, %15, %cst_21 {dimension_numbers = #tpu.dot_dimension_numbers<[1], [0], [0], [1], [0, 0, 1, 1], [], []>} : vector<128x128xf32>, vector<128x128xf32>, vector<128x128xf32> -> vector<128x128xf32>
    %28 = vector.broadcast %17 : vector<1x128xf32> to vector<128x128xf32>
    %29 = arith.addf %27, %28 : vector<128x128xf32>
    %30 = math.exp %25 : vector<128x128xf32>
    %31 = arith.mulf %30, %5 : vector<128x128xf32>
    %32 = arith.addf %31, %29 : vector<128x128xf32>
    %cst_22 = arith.constant dense<0.000000e+00> : vector<128xf32>
    %33 = vector.multi_reduction <add>, %25, %cst_22 [1] : vector<128x128xf32> to vector<128xf32>
    %34 = vector.shape_cast %33 : vector<128xf32> to vector<128x1xf32>
    %c1 = arith.constant 1 : index
    %c0_23 = arith.constant 0 : index
    %c0_24 = arith.constant 0 : index
    %35 = vector.load %arg3[%c1, %c0_23, %c0_24] : memref<2x128x256xf32, #tpu.memory_space<vmem>>, vector<1x128x256xf32>
    %36 = vector.shape_cast %35 : vector<1x128x256xf32> to vector<128x256xf32>
    %c1_25 = arith.constant 1 : index
    %c0_26 = arith.constant 0 : index
    %c0_27 = arith.constant 0 : index
    %37 = vector.load %arg4[%c1_25, %c0_26, %c0_27] : memref<2x1x256xf32, #tpu.memory_space<vmem>>, vector<1x1x256xf32>
    %38 = vector.shape_cast %37 : vector<1x1x256xf32> to vector<1x256xf32>
    %c1_28 = arith.constant 1 : index
    %c0_29 = arith.constant 0 : index
    %c0_30 = arith.constant 0 : index
    %39 = vector.load %arg5[%c1_28, %c0_29, %c0_30] : memref<2x128x128xf32, #tpu.memory_space<vmem>>, vector<1x128x128xf32>
    %40 = vector.shape_cast %39 : vector<1x128x128xf32> to vector<128x128xf32>
    %c1_31 = arith.constant 1 : index
    %c0_32 = arith.constant 0 : index
    %c0_33 = arith.constant 0 : index
    %41 = vector.load %arg6[%c1_31, %c0_32, %c0_33] : memref<2x1x128xf32, #tpu.memory_space<vmem>>, vector<1x1x128xf32>
    %42 = vector.shape_cast %41 : vector<1x1x128xf32> to vector<1x128xf32>
    %c1_34 = arith.constant 1 : index
    %c0_35 = arith.constant 0 : index
    %c0_36 = arith.constant 0 : index
    %43 = vector.load %arg7[%c1_34, %c0_35, %c0_36] : memref<2x128x128xf32, #tpu.memory_space<vmem>>, vector<1x128x128xf32>
    %44 = vector.shape_cast %43 : vector<1x128x128xf32> to vector<128x128xf32>
    %c1_37 = arith.constant 1 : index
    %c0_38 = arith.constant 0 : index
    %c0_39 = arith.constant 0 : index
    %45 = vector.load %arg8[%c1_37, %c0_38, %c0_39] : memref<2x1x128xf32, #tpu.memory_space<vmem>>, vector<1x1x128xf32>
    %46 = vector.shape_cast %45 : vector<1x1x128xf32> to vector<1x128xf32>
    %cst_40 = arith.constant dense<0.000000e+00> : vector<128x256xf32>
    %47 = tpu.matmul %32, %36, %cst_40 {dimension_numbers = #tpu.dot_dimension_numbers<[1], [0], [0], [1], [0, 0, 1, 1], [], []>} : vector<128x128xf32>, vector<128x256xf32>, vector<128x256xf32> -> vector<128x256xf32>
    %48 = vector.broadcast %38 : vector<1x256xf32> to vector<128x256xf32>
    %49 = arith.addf %47, %48 : vector<128x256xf32>
    %50 = math.tanh %49 : vector<128x256xf32>
    %51 = vector.extract_strided_slice %50 {offsets = [0, 0], sizes = [128, 128], strides = [1, 1]} : vector<128x256xf32> to vector<128x128xf32>
    %cst_41 = arith.constant dense<0.000000e+00> : vector<128x128xf32>
    %52 = tpu.matmul %51, %40, %cst_41 {dimension_numbers = #tpu.dot_dimension_numbers<[1], [0], [0], [1], [0, 0, 1, 1], [], []>} : vector<128x128xf32>, vector<128x128xf32>, vector<128x128xf32> -> vector<128x128xf32>
    %53 = vector.broadcast %42 : vector<1x128xf32> to vector<128x128xf32>
    %54 = arith.addf %52, %53 : vector<128x128xf32>
    %55 = vector.extract_strided_slice %50 {offsets = [0, 128], sizes = [128, 128], strides = [1, 1]} : vector<128x256xf32> to vector<128x128xf32>
    %cst_42 = arith.constant dense<0.000000e+00> : vector<128x128xf32>
    %56 = tpu.matmul %55, %44, %cst_42 {dimension_numbers = #tpu.dot_dimension_numbers<[1], [0], [0], [1], [0, 0, 1, 1], [], []>} : vector<128x128xf32>, vector<128x128xf32>, vector<128x128xf32> -> vector<128x128xf32>
    %57 = vector.broadcast %46 : vector<1x128xf32> to vector<128x128xf32>
    %58 = arith.addf %56, %57 : vector<128x128xf32>
    %59 = math.exp %54 : vector<128x128xf32>
    %60 = arith.mulf %59, %4 : vector<128x128xf32>
    %61 = arith.addf %60, %58 : vector<128x128xf32>
    %cst_43 = arith.constant dense<0.000000e+00> : vector<128xf32>
    %62 = vector.multi_reduction <add>, %54, %cst_43 [1] : vector<128x128xf32> to vector<128xf32>
    %63 = vector.shape_cast %62 : vector<128xf32> to vector<128x1xf32>
    %c0_44 = arith.constant 0 : index
    %c0_45 = arith.constant 0 : index
    %64 = vector.load %arg9[%c0_44, %c0_45] : memref<128x256xf32, #tpu.memory_space<vmem>>, vector<128x128xf32>
    tpu.vector_store %arg9[%c0_44, %c0_45], %61 {strides = array<i32>} : memref<128x256xf32, #tpu.memory_space<vmem>>, vector<128x128xf32>,
    %c0_46 = arith.constant 0 : index
    %c128 = arith.constant 128 : index
    %65 = vector.load %arg9[%c0_46, %c128] : memref<128x256xf32, #tpu.memory_space<vmem>>, vector<128x128xf32>
    tpu.vector_store %arg9[%c0_46, %c128], %32 {strides = array<i32>} : memref<128x256xf32, #tpu.memory_space<vmem>>, vector<128x128xf32>,
    %c0_47 = arith.constant 0 : index
    %c0_48 = arith.constant 0 : index
    %66 = vector.load %arg10[%c0_47, %c0_48] : memref<128x1xf32, #tpu.memory_space<vmem>>, vector<128x1xf32>
    %67 = arith.addf %66, %34 : vector<128x1xf32>
    %68 = arith.addf %67, %63 : vector<128x1xf32>
    %c0_49 = arith.constant 0 : index
    %c0_50 = arith.constant 0 : index
    %69 = vector.load %arg10[%c0_49, %c0_50] : memref<128x1xf32, #tpu.memory_space<vmem>>, vector<128x1xf32>
    tpu.vector_store %arg10[%c0_49, %c0_50], %68 {strides = array<i32>} : memref<128x1xf32, #tpu.memory_space<vmem>>, vector<128x1xf32>,
    return
  }
  func.func @transform_0(%arg0: i32, %arg1: i32) -> (i32, i32) {
    %c0_i32 = arith.constant 0 : i32
    %c0_i32_0 = arith.constant 0 : i32
    return %arg0, %c0_i32 : i32, i32
  }
  func.func @transform_1(%arg0: i32, %arg1: i32) -> (i32, i32, i32) {
    %c0_i32 = arith.constant 0 : i32
    %c0_i32_0 = arith.constant 0 : i32
    %c0_i32_1 = arith.constant 0 : i32
    return %arg1, %c0_i32, %c0_i32_0 : i32, i32, i32
  }
  func.func @transform_2(%arg0: i32, %arg1: i32) -> (i32, i32, i32) {
    %c0_i32 = arith.constant 0 : i32
    %c0_i32_0 = arith.constant 0 : i32
    %c0_i32_1 = arith.constant 0 : i32
    return %arg1, %c0_i32, %c0_i32_0 : i32, i32, i32
  }
  func.func @transform_3(%arg0: i32, %arg1: i32) -> (i32, i32, i32) {
    %c0_i32 = arith.constant 0 : i32
    %c0_i32_0 = arith.constant 0 : i32
    %c0_i32_1 = arith.constant 0 : i32
    return %arg1, %c0_i32, %c0_i32_0 : i32, i32, i32
  }
  func.func @transform_4(%arg0: i32, %arg1: i32) -> (i32, i32, i32) {
    %c0_i32 = arith.constant 0 : i32
    %c0_i32_0 = arith.constant 0 : i32
    %c0_i32_1 = arith.constant 0 : i32
    return %arg1, %c0_i32, %c0_i32_0 : i32, i32, i32
  }
  func.func @transform_5(%arg0: i32, %arg1: i32) -> (i32, i32, i32) {
    %c0_i32 = arith.constant 0 : i32
    %c0_i32_0 = arith.constant 0 : i32
    %c0_i32_1 = arith.constant 0 : i32
    return %arg1, %c0_i32, %c0_i32_0 : i32, i32, i32
  }
  func.func @transform_6(%arg0: i32, %arg1: i32) -> (i32, i32, i32) {
    %c0_i32 = arith.constant 0 : i32
    %c0_i32_0 = arith.constant 0 : i32
    %c0_i32_1 = arith.constant 0 : i32
    return %arg1, %c0_i32, %c0_i32_0 : i32, i32, i32
  }
  func.func @transform_7(%arg0: i32, %arg1: i32) -> (i32, i32) {
    %c0_i32 = arith.constant 0 : i32
    %c0_i32_0 = arith.constant 0 : i32
    return %arg0, %c0_i32 : i32, i32
  }
  func.func @transform_8(%arg0: i32, %arg1: i32) -> (i32, i32) {
    %c0_i32 = arith.constant 0 : i32
    %c0_i32_0 = arith.constant 0 : i32
    return %arg0, %c0_i32 : i32, i32
  }
}

</mosaic_0001>

<bundles_post_ra>
// kernel: tpu_custom_call.1
= control target key start
LH: loop header
LB: loop body
LE: loop exit
PB: predicated region body
PF: predicated region fallthrough
CT: control target
= control target key end

     0   :  { %s4519_s0 = inlined_call_operand.hbm [shape: f32[256,256], index: 0, kind: input, shape index: {}]   ;;  %s4520_s1 = inlined_call_operand.hbm [shape: f32[4,128,256], index: 1, kind: input, shape index: {}]   ;;  %s4521_s2 = inlined_call_operand.hbm [shape: f32[4,1,256], index: 2, kind: input, shape index: {}]   ;;  %s4522_s3 = inlined_call_operand.hbm [shape: f32[4,128,128], index: 3, kind: input, shape index: {}]   ;;  %s4523_s4 = inlined_call_operand.vmem [shape: f32[4,1,128], index: 4, kind: input, shape index: {}]   ;;  %s4524_s5 = inlined_call_operand.hbm [shape: f32[4,128,128], index: 5, kind: input, shape index: {}]   ;;  %s4525_s6 = inlined_call_operand.vmem [shape: f32[4,1,128], index: 6, kind: input, shape index: {}]   ;;  %s4526_s7 = inlined_call_operand.hbm [shape: f32[256,256], index: 7, kind: output, shape index: {0}]   ;;  %s4527_s8 = inlined_call_operand.vmem [shape: f32[256,1], index: 8, kind: output, shape index: {1}]  }
   0x1   :  { %4545 = sst [smem:[#allocation27_spill]] %s4519_s0 }
   0x2   :  { %4546 = sst [smem:[#allocation28_spill]] %s4520_s1 }
   0x3   :  { %4547 = sst [smem:[#allocation29_spill]] %s4522_s3 }
   0x4   :  { %4548 = sst [smem:[#allocation30_spill]] %s4523_s4 }
   0x5   :  { %4549 = sst [smem:[#allocation31_spill]] %s4524_s5 }
   0x6   :  { %4550 = sst [smem:[#allocation32_spill]] %s4525_s6 }
   0x7   :  { %4551 = sst [smem:[#allocation33_spill]] %s4526_s7 }
   0x8   :  { %4552 = sst [smem:[#allocation34_spill]] %s4527_s8 }
   0x9   :  { %14 = vsyncpa [#allocation3], 0 }
   0xa   :  { %16 = vsyncpa [#allocation3 + $0x1], 0 }
   0xb   :  { %17 = vsyncpa [#allocation6], 0 }
   0xc   :  { %19 = vsyncpa [#allocation6 + $0x1], 0 }
   0xd   :  { %20 = vsyncpa [#allocation9], 0 }
   0xe   :  { %22 = vsyncpa [#allocation9 + $0x1], 0 }
   0xf   :  { %23 = vsyncpa [#allocation4], 0 }
  0x10   :  { %25 = vsyncpa [#allocation4 + $0x1], 0  ;;  %s3496_s27 = smov 0   ;;  %s3498_s28 = smov 0  }
  0x11   :  { %s3500_s29 = smov 0   ;;  %s3502_s30 = smov 0  }
  0x12   :  { %s3504_s9 = smov 0   ;;  %s3506_s10 = smov 0  }
  0x13   :  { %s3508_s11 = smov 0   ;;  %s3510_s12 = smov 0  }
  0x14   :  { %s3512_s13 = smov 0   ;;  %s3514_s14 = smov 0  }
  0x15   :  { %s3516_s15 = smov 0  }
  0x16 LB: > { %4553 = sst [smem:[#allocation16_spill]] %s3397_s28  ;;  %s40_s16 = sadd.s32 1, %s3425_s13  ;;  %s3433_s15 = sphi %s3516_s15, %s31_s15   ;;  %s3429_s14 = sphi %s3514_s14, %s4607_s14   ;;  %s3425_s13 = sphi %s3512_s13, %s4606_s13   ;;  %s3421_s12 = sphi %s3510_s12, %s4600_s12   ;;  %s3417_s11 = sphi %s3508_s11, %s4605_s11   ;;  %s3413_s10 = sphi %s3506_s10, %s4599_s10   ;;  %s3409_s9 = sphi %s3504_s9, %s4604_s9   ;;  %s3405_s30 = sphi %s3502_s30, %s4603_s30   ;;  %s3401_s29 = sphi %s3500_s29, %s4597_s29   ;;  %s3397_s28 = sphi %s3498_s28, %s4596_s28   ;;  %s3393_s27 = sphi %s3496_s27, %s4595_s27  }
  0x17   : > { %4554 = sst [smem:[#allocation17_spill]] %s3401_s29  ;;  %p58_p0 = scmp.eq.s32.totalorder %s3433_s15, 0 }
  0x18   : > { %4555 = sst [smem:[#allocation18_spill]] %s3413_s10  ;;  %p3553_p1 = scmp.ge.s32.totalorder %s40_s16, 2 }
  0x19   : > { %4556 = sst [smem:[#allocation19_spill]] %s3417_s11  ;;  %s76_s18 = sadd.s32 1, %s3401_s29 }
  0x1a   : > { %4557 = sst [smem:[#allocation20_spill]] %s3421_s12  ;;  %p83_p2 = scmp.ne.s32.totalorder %s3401_s29, %s3397_s28 }
  0x1b   : > { %4558 = sst [smem:[#allocation21_spill]] %s3429_s14  ;;  %p89_p3 = scmp.ne.s32.totalorder %s3397_s28, %s3393_s27 }
  0x1c   : > { %s4609_s16 = smov (%p3553_p1, %s40_s16), 0  ;;  %p85_p4 = por %p83_p2, %p58_p0 }
  0x1d   : > { %4560 = sst [smem:[#allocation22_spill]] %s4609_s16  ;;  %s73_s19 = ssub.s32 %s3425_s13, %s4609_s16 }
  0x1e   : > { %p4529_p5 = scmp.lt.s32.totalorder %s3433_s15, 4  ;;  %p74_p6 = scmp.eq.s32.totalorder %s73_s19, 0 }
  0x1f   : > { %s4530_s20 = sand.u32 1, %s3433_s15   ;;  %s3576_s22 = sand.u32 1, %s3401_s29  }
  0x20   : > { %s3573_s21 = scalar_select %p74_p6, %s3401_s29, %s76_s18  }
  0x21   : > { %s2356_s23 = sshll.u32 %s3576_s22, 9  ;;  %s2464_s24 = sshll.u32 %s3425_s13, 13 }
  0x22   : > { %4561 = sst [smem:[#allocation23_spill]] %s3573_s21  ;;  %s321_s8 = scalar_lea.vmem [#allocation5], %s2356_s23 }
  0x23   : > { %s4562_s1 = sld [smem:[#allocation28_spill]]  ;;  %s329_s6 = sshll.u32 %s321_s8, 4  ;;  %s330_s6 = int_to_ptr.vmem [resolvable:$true] %s329_s6 }
  0x24   : > { %p3585_p7 = pnand %p4529_p5, %p85_p4  ;;  %p2372_p8 = scmp.ge.s32.totalorder %s3433_s15, 1 }
  0x25   : > { %p419_p9 = scmp.lt.s32.totalorder %s3433_s15, 5  ;;  %s3593_s18 = scalar_lea.sflag [#allocation6], %s4530_s20 }
  0x26   : > { %p4538_p10 = pneg %p3585_p7  ;;  %s3178_s19 = scalar_lea.vmem %s330_s6, 8192 }
  0x27   : > { %p3179_p11 = scmp.ne.s32.totalorder %s330_s6, %s3178_s19  ;;  %s3435_s8 = smov [#allocation5]  }
  0x28   : > { %s3183_s23 = sshll.u32 %s3435_s8, 4  ;;  %s3184_s23 = int_to_ptr.vmem [resolvable:$false] %s3183_s23 }
  0x29   : > { %s328_s7 = scalar_lea.hbm %s4562_s1, %s2464_s24  ;;  %p3181_p12 = pnand %p3179_p11, %p4538_p10 }
  0x2a   : > { %s3185_s24 = scalar_lea.vmem %s3184_s23, 16384  ;;  %p3186_p2 = scmp.lt.s32.totalorder %s330_s6, %s3184_s23 }
  0x2b   : > { %p3182_p13 = pneg %p3181_p12  ;;  %p3187_p4 = scmp.lt.s32.totalorder %s3185_s24, %s3178_s19 }
  0x2d   : > { %p3188_p6 = por %p3187_p4, %p3186_p2 }
  0x2f   : > { %p3189_p5 = pnand %p3188_p6, %p3182_p13 }
  0x31   : > { %3192 = shalt.err (!%p3189_p5)
}
  0x32   : > { %s4534_s25 = smov 256   ;;  %s4535_s26 = smov 16  }
  0x33   : > { %2843 = dma.hbm_to_vmem [thread:$0]  (!%p3585_p7), %s328_s7, 8192, %s330_s6, %s3593_s18, %s4534_s25, %s4534_s25, %s4535_s26  }
  0x34   : > { %p3610_p11 = pnand %p2372_p8, %p419_p9  ;;  %s2364_s8 = sshll.u32 %s3576_s22, 8 }
  0x35   : > { %s2468_s23 = sshll.u32 %s3425_s13, 12  ;;  %s4565_s3 = sld [smem:[#allocation29_spill]] }
  0x36   : > { %s365_s16 = scalar_lea.vmem [#allocation8], %s2364_s8  ;;  %s4566_s29 = sand.u32 1, %s3433_s15  }
  0x37   : > { %s373_s21 = sshll.u32 %s365_s16, 4  ;;  %s3621_s12 = scalar_lea.sflag [#allocation9], %s4566_s29  ;;  %s374_s21 = int_to_ptr.vmem [resolvable:$true] %s373_s21 }
  0x38   : > { %s3206_s11 = scalar_lea.vmem %s374_s21, 4096  ;;  %s3438_s6 = smov [#allocation8]  }
  0x39   : > { %p3207_p5 = scmp.ne.s32.totalorder %s374_s21, %s3206_s11  ;;  %s3211_s7 = sshll.u32 %s3438_s6, 4  ;;  %s3212_s7 = int_to_ptr.vmem [resolvable:$false] %s3211_s7 }
  0x3a   : > { %s3213_s25 = scalar_lea.vmem %s3212_s7, 8192  ;;  %p3214_p12 = scmp.lt.s32.totalorder %s374_s21, %s3212_s7 }
  0x3b   : > { %s372_s1 = scalar_lea.hbm %s4565_s3, %s2468_s23  ;;  %p3209_p8 = pnand %p3207_p5, %p4538_p10 }
  0x3c   : > { %p3215_p13 = scmp.lt.s32.totalorder %s3213_s25, %s3206_s11 }
  0x3d   : > { %p3210_p9 = pneg %p3209_p8 }
  0x3e   : > { %p3216_p2 = por %p3215_p13, %p3214_p12 }
  0x40   : > { %p3217_p4 = pnand %p3216_p2, %p3210_p9 }
  0x42   : > { %3220 = shalt.err (!%p3217_p4)
}
  0x43   : > { %s4536_s16 = smov 128   ;;  %s4537_s29 = smov 8  }
  0x44   : > { %2849 = dma.hbm_to_vmem [thread:$0]  (!%p3585_p7), %s372_s1, 4096, %s374_s21, %s3621_s12, %s4536_s16, %s4536_s16, %s4537_s29  }
  0x45   : > { %s4567_s5 = sld [smem:[#allocation31_spill]]  ;;  %s395_s24 = scalar_lea.vmem [#allocation10], %s2364_s8 }
  0x46   : > { %s403_s6 = sshll.u32 %s395_s24, 4  ;;  %s3640_s7 = sadd.s32 4294967295, %s3433_s15   ;;  %s3637_s6 = int_to_ptr.vmem [resolvable:$true] %s403_s6 }
  0x47   : > { %s2349_s26 = sadd.s32 4294967294, %s3433_s15   ;;  %s43_s1 = sadd.s32 1, %s3429_s14 }
  0x48   : > { %s50_s21 = sadd.s32 1, %s3413_s10  ;;  %s4611_s1 = smov (!%p3553_p1, %s43_s1), %s3429_s14 }
  0x49   : > { %p57_p6 = scmp.ne.s32.totalorder %s3413_s10, %s3409_s9  ;;  %p63_p5 = scmp.ne.s32.totalorder %s3409_s9, %s3405_s30 }
  0x4a   : > { %p45_p8 = scmp.ge.s32.totalorder %s4611_s1, 2  ;;  %p64_p9 = scmp.eq.s32.totalorder %s3640_s7, 0 }
  0x4b   : > { %s3635_s25 = scalar_lea.hbm %s4567_s5, %s2468_s23  ;;  %p3655_p12 = por %p58_p0, %p57_p6 }
  0x4c   : > { %p243_p13 = scmp.eq.s32.totalorder %s3640_s7, 3  ;;  %s4613_s1 = smov (%p45_p8, %s4611_s1), 0 }
  0x4d   : > { %4569 = sst [smem:[#allocation24_spill]] %s4613_s1  ;;  %p3665_p1 = por %p64_p9, %p63_p5 }
  0x4e   : > { %p3672_p2 = por %p89_p3, %p64_p9  ;;  %s47_s11 = ssub.s32 %s3429_s14, %s4613_s1 }
  0x4f   : > { %p3678_p0 = por %p243_p13, %p57_p6  ;;  %p48_p4 = scmp.eq.s32.totalorder %s47_s11, 0 }
  0x50   : > { %p249_p8 = scmp.eq.s32.totalorder %s2349_s26, 3  ;;  %s295_s24 = sand.u32 1, %s3413_s10  }
  0x51   : > { %s4572_s20 = scalar_select %p3678_p0, 1, 0 }
  0x52   : > { %s2462_s16 = sshll.u32 %s3429_s14, 12  ;;  %p3690_p10 = por %p249_p8, %p63_p5 }
  0x53   : > { %4573 = sst [smem:[#allocation25_spill]] %s4572_s20  ;;  %s2352_s27 = sshll.u32 %s295_s24, 8 }
  0x54   : > { %s3685_s29 = scalar_select %p48_p4, %s3413_s10, %s50_s21  }
  0x55   : > { %s4575_s3 = scalar_select %p3690_p10, 1, 0 }
  0x56   : > { %4574 = sst [smem:[#allocation26_spill]] %s3685_s29  ;;  %p4577_p3 = scmp.lt.s32.totalorder %s3433_s15, 4 }
  0x57   : > { %s4576_s0 = sld [smem:[#allocation27_spill]]  ;;  %s299_s26 = scalar_lea.vmem [#allocation2], %s2352_s27 }
  0x58   : > { %p3701_p6 = pnand %p4577_p3, %p3655_p12  ;;  %s307_s21 = sshll.u32 %s299_s26, 4  ;;  %s308_s21 = int_to_ptr.vmem [resolvable:$true] %s307_s21 }
  0x59   : > { %s2360_s11 = sshll.u32 %s3576_s22, 2  ;;  %s296_s14 = scalar_lea.sflag [#allocation3], %s295_s24 }
  0x5a   : > { %p3223_p5 = pneg %p3701_p6  ;;  %s3234_s29 = scalar_lea.vmem %s308_s21, 4096 }
  0x5b   : > { %p3235_p9 = scmp.ne.s32.totalorder %s308_s21, %s3234_s29  ;;  %s3441_s5 = smov [#allocation2]  }
  0x5c   : > { %s3239_s28 = sshll.u32 %s3441_s5, 4  ;;  %s3240_s28 = int_to_ptr.vmem [resolvable:$false] %s3239_s28 }
  0x5d   : > { %s306_s1 = scalar_lea.hbm %s4576_s0, %s2462_s16  ;;  %p3237_p13 = pnand %p3235_p9, %p3223_p5 }
  0x5e   : > { %s3241_s16 = scalar_lea.vmem %s3240_s28, 8192  ;;  %p3242_p12 = scmp.lt.s32.totalorder %s308_s21, %s3240_s28 }
  0x5f   : > { %p3238_p4 = pneg %p3237_p13  ;;  %p3243_p8 = scmp.lt.s32.totalorder %s3241_s16, %s3234_s29 }
  0x61   : > { %p3244_p3 = por %p3243_p8, %p3242_p12 }
  0x63   : > { %p3245_p10 = pnand %p3244_p3, %p3238_p4 }
  0x65   : > { %3248 = shalt.err (!%p3245_p10)
}
  0x66   : > { %s4579_s22 = smov 16   ;;  %s4580_s8 = smov 256  }
  0x67   : > { %2840 = dma.hbm_to_vmem [thread:$0]  (!%p3701_p6), %s306_s1, 4096, %s308_s21, %s296_s14, %s4580_s8, %s4580_s8, %s4579_s22  }
  0x68   : > { %s2466_s24 = sshll.u32 %s3425_s13, 6  ;;  %s343_s0 = scalar_lea.vmem [#allocation7], %s2360_s11 }
  0x69   : > { %s350_s5 = scalar_lea.hbm %s4521_s2, %s2466_s24  ;;  %s351_s10 = sshll.u32 %s343_s0, 4  ;;  %s352_s10 = int_to_ptr.vmem [resolvable:$true] %s351_s10 }
  0x6a   : > { %s3262_s29 = scalar_lea.vmem %s352_s10, 64  ;;  %p4581_p10 = pneg %p3585_p7 }
  0x6b   : > { %p3263_p5 = scmp.ne.s32.totalorder %s352_s10, %s3262_s29  ;;  %s3442_s20 = smov [#allocation7]  }
  0x6c   : > { %s3267_s28 = sshll.u32 %s3442_s20, 4  ;;  %s3268_s28 = int_to_ptr.vmem [resolvable:$false] %s3267_s28 }
  0x6d   : > { %p3265_p9 = pnand %p3263_p5, %p4581_p10  ;;  %s3269_s16 = scalar_lea.vmem %s3268_s28, 128 }
  0x6e   : > { %p3270_p4 = scmp.lt.s32.totalorder %s352_s10, %s3268_s28  ;;  %p3271_p6 = scmp.lt.s32.totalorder %s3269_s16, %s3262_s29 }
  0x6f   : > { %p3266_p13 = pneg %p3265_p9 }
  0x70   : > { %p3272_p12 = por %p3271_p6, %p3270_p4 }
  0x72   : > { %p3273_p8 = pnand %p3272_p12, %p3266_p13 }
  0x74   : > { %3276 = shalt.err (!%p3273_p8)
}
  0x75   : > { %s3443_s14 = smov 32   ;;  %s3444_s0 = smov 2  }
  0x76   : > { %2846 = dma.hbm_to_vmem [thread:$0]  (!%p3585_p7), %s350_s5, 64, %s352_s10, %s3593_s18, %s3443_s14, %s3443_s14, %s3444_s0  }
  0x77   : > { %s3290_s1 = scalar_lea.vmem %s3637_s6, 4096  ;;  %p4582_p5 = pmov %p4581_p10 }
  0x78   : > { %p3291_p3 = scmp.ne.s32.totalorder %s3637_s6, %s3290_s1  ;;  %s3445_s21 = smov [#allocation10]  }
  0x79   : > { %s3295_s11 = sshll.u32 %s3445_s21, 4  ;;  %s3296_s11 = int_to_ptr.vmem [resolvable:$false] %s3295_s11 }
  0x7a   : > { %p3293_p10 = pnand %p3291_p3, %p4582_p5  ;;  %s3297_s22 = scalar_lea.vmem %s3296_s11, 8192 }
  0x7b   : > { %p3298_p13 = scmp.lt.s32.totalorder %s3637_s6, %s3296_s11  ;;  %p3299_p4 = scmp.lt.s32.totalorder %s3297_s22, %s3290_s1 }
  0x7c   : > { %p3294_p9 = pneg %p3293_p10 }
  0x7d   : > { %p3300_p6 = por %p3299_p4, %p3298_p13 }
  0x7f   : > { %p3301_p12 = pnand %p3300_p6, %p3294_p9 }
  0x81   : > { %3304 = shalt.err (!%p3301_p12)
}
  0x82   : > { %s4583_s8 = smov 8   ;;  %s4584_s24 = smov 128  }
  0x83   : > { %2852 = dma.hbm_to_vmem [thread:$0]  (!%p3585_p7), %s3635_s25, 4096, %s3637_s6, %s3621_s12, %s4584_s24, %s4584_s24, %s4583_s8  }
  0x84   : > { %423 = sbr.rel (%p3610_p11) target bundleno = 1303 (0x517), region = 48  ;;  %s3740_s10 = sand.u32 (!%p3610_p11), 1, %s3409_s9  }
  0x85   : > { %s2373_s18 = sshll.u32 (!%p3610_p11), %s3740_s10, 8  ;;  %s426_s27 = scalar_lea.sflag (!%p3610_p11), [#allocation3], %s3740_s10 }
  0x86   : > { %s3746_s4 = scalar_lea.vmem (!%p3610_p11), [#allocation2], %s2373_s18 }
  0x89   : > { %3376 = dma.done.wait (%p3665_p1), %s426_s27, 4096  }
  0x8a   : > { %3378 = vsyncadd (%p3665_p1), %s426_s27, 4294963200  ;;  %s4585_s12 = sld [smem:[#allocation16_spill]]  ;;  %s434_s19 = sand.u32 1, %s3640_s7  }
  0x8b   : > { %s435_s26 = scalar_lea.sflag [#allocation6], %s434_s19 }
  0x90   : > { %s436_s25 = sand.u32 1, %s4585_s12  }
  0x91   : > { %s2374_s6 = sshll.u32 %s436_s25, 9 }
  0x92   : > { %s3754_s5 = scalar_lea.vmem [#allocation5], %s2374_s6 }
  0x93   : > { %3380 = dma.done.wait (%p3672_p2), %s435_s26, 8256  }
  0x94   : > { %3382 = vsyncadd (%p3672_p2), %s435_s26, 4294959040  ;;  %s2375_s29 = sshll.u32 %s436_s25, 2  ;;  %s2376_s20 = sshll.u32 %s436_s25, 8 }
  0x95   : > { %s3760_s28 = scalar_lea.vmem [#allocation7], %s2375_s29  ;;  %s453_s17 = scalar_lea.sflag [#allocation9], %s434_s19 }
  0x96   : > { %s3762_s16 = scalar_lea.vmem [#allocation8], %s2376_s20 }
  0x97   : > { %3384 = dma.done.wait (%p3672_p2), %s453_s17, 8192  }
  0x98   : > { %3386 = vsyncadd (%p3672_p2), %s453_s17, 4294959104  ;;  %s4586_s7 = sld [smem:[#allocation19_spill]]  ;;  %s3785_s17 = scalar_lea.vmem [#allocation10], %s2376_s20 }
  0x99   : > { %s4587_s14 = sld [smem:[#allocation20_spill]] }
  0x9a   : > { %s4588_s22 = sld [smem:[#allocation30_spill]] }
  0x9b   : > { %s4589_s12 = sld [smem:[#allocation32_spill]] }
  0x9c   : > { %s4590_s26 = sld [smem:[#allocation34_spill]] }
  0x9e   : > { %s2379_s0 = sshll.u32 %s4586_s7, 1  ;;  %p2383_p1 = scmp.ne.s32.totalorder %s4586_s7, 0 }
  0x9f   : > { %s2381_s1 = sshll.u32 %s4587_s14, 4  ;;  %p536_p7 = scmp.lt.s32.totalorder %s2379_s0, 3 }
  0xa0   : > { %p548_p11 = scmp.lt.s32.totalorder %s2381_s1, 31  ;;  %s3789_s14 = scalar_lea.vmem [#allocation11], %s2373_s18 }
  0xa1   : > { %s4615_s0 = smov (!%p536_p7, %s2379_s0), 3  ;;  %556 = sbr.rel (%p2383_p1) target bundleno = 191 (0xbf), region = 72 }
  0xa2   : > { %s4617_s1 = smov (!%p548_p11, %s2381_s1), 31  ;;  %s3773_s8 = scalar_lea.vmem %s4588_s22, %s4615_s0 }
  0xa3   : > { %s3778_s19 = scalar_lea.vmem %s4589_s12, %s4615_s0  ;;  %s2382_s23 = sshll.u32 %s4617_s1, 3 }
  0xa4   : > { %s3783_s29 = scalar_lea.vmem %s4590_s26, %s2382_s23 }
  0xa6   : > { %v557_v0 = vld [vmem:[%s3746_s4] sm:$0xff]  ;;  %v558_v1 = vld [vmem:[%s3746_s4 + $0x8] sm:$0xff]  ;;  %v559_v2 = vld [vmem:[%s3746_s4 + $0x10] sm:$0xff]  ;;  %vm621_vm0 = vcmask 7168   ;;  %v3446_v6 = vmov 0.0  }
  0xa7   : > { %589 = vst [vmem:[%s3789_s14] sm:$0xff] %v557_v0  ;;  %590 = vst [vmem:[%s3789_s14 + $0x8] sm:$0xff] %v558_v1  ;;  %v560_v3 = vld [vmem:[%s3746_s4 + $0x18] sm:$0xff]  ;;  %v561_v4 = vld [vmem:[%s3746_s4 + $0x20] sm:$0xff] }
  0xa8   : > { %591 = vst [vmem:[%s3789_s14 + $0x10] sm:$0xff] %v559_v2  ;;  %v562_v5 = vld [vmem:[%s3746_s4 + $0x28] sm:$0xff]  ;;  %622 = vst.msk [vmem:[%s3783_s29] sm:$0xff] %vm621_vm0, %v3446_v6  ;;  %v563_v7 = vld [vmem:[%s3746_s4 + $0x30] sm:$0xff] }
  0xa9   : > { %623 = vst.msk [vmem:[%s3783_s29 + $0x8] sm:$0xff] %vm621_vm0, %v3446_v6  ;;  %624 = vst.msk [vmem:[%s3783_s29 + $0x10] sm:$0xff] %vm621_vm0, %v3446_v6  ;;  %v564_v8 = vld [vmem:[%s3746_s4 + $0x38] sm:$0xff]  ;;  %v565_v9 = vld [vmem:[%s3746_s4 + $0x40] sm:$0xff] }
  0xaa   : > { %625 = vst.msk [vmem:[%s3783_s29 + $0x18] sm:$0xff] %vm621_vm0, %v3446_v6  ;;  %626 = vst.msk [vmem:[%s3783_s29 + $0x20] sm:$0xff] %vm621_vm0, %v3446_v6  ;;  %v566_v10 = vld [vmem:[%s3746_s4 + $0x48] sm:$0xff]  ;;  %v567_v11 = vld [vmem:[%s3746_s4 + $0x50] sm:$0xff] }
  0xab   : > { %627 = vst.msk [vmem:[%s3783_s29 + $0x28] sm:$0xff] %vm621_vm0, %v3446_v6  ;;  %628 = vst.msk [vmem:[%s3783_s29 + $0x30] sm:$0xff] %vm621_vm0, %v3446_v6  ;;  %v568_v12 = vld [vmem:[%s3746_s4 + $0x58] sm:$0xff]  ;;  %v569_v13 = vld [vmem:[%s3746_s4 + $0x60] sm:$0xff] }
  0xac   : > { %629 = vst.msk [vmem:[%s3783_s29 + $0x38] sm:$0xff] %vm621_vm0, %v3446_v6  ;;  %630 = vst.msk [vmem:[%s3783_s29 + $0x40] sm:$0xff] %vm621_vm0, %v3446_v6  ;;  %v570_v14 = vld [vmem:[%s3746_s4 + $0x68] sm:$0xff]  ;;  %v571_v15 = vld [vmem:[%s3746_s4 + $0x70] sm:$0xff] }
  0xad   : > { %631 = vst.msk [vmem:[%s3783_s29 + $0x48] sm:$0xff] %vm621_vm0, %v3446_v6  ;;  %632 = vst.msk [vmem:[%s3783_s29 + $0x50] sm:$0xff] %vm621_vm0, %v3446_v6  ;;  %v572_v16 = vld [vmem:[%s3746_s4 + $0x78] sm:$0xff]  ;;  %v573_v17 = vld [vmem:[%s3746_s4 + $0x80] sm:$0xff] }
  0xae   : > { %633 = vst.msk [vmem:[%s3783_s29 + $0x58] sm:$0xff] %vm621_vm0, %v3446_v6  ;;  %634 = vst.msk [vmem:[%s3783_s29 + $0x60] sm:$0xff] %vm621_vm0, %v3446_v6  ;;  %v574_v18 = vld [vmem:[%s3746_s4 + $0x88] sm:$0xff]  ;;  %v575_v19 = vld [vmem:[%s3746_s4 + $0x90] sm:$0xff] }
  0xaf   : > { %635 = vst.msk [vmem:[%s3783_s29 + $0x68] sm:$0xff] %vm621_vm0, %v3446_v6  ;;  %636 = vst.msk [vmem:[%s3783_s29 + $0x70] sm:$0xff] %vm621_vm0, %v3446_v6  ;;  %v576_v20 = vld [vmem:[%s3746_s4 + $0x98] sm:$0xff]  ;;  %v577_v21 = vld [vmem:[%s3746_s4 + $0xa0] sm:$0xff] }
  0xb0   : > { %637 = vst.msk [vmem:[%s3783_s29 + $0x78] sm:$0xff] %vm621_vm0, %v3446_v6  ;;  %592 = vst [vmem:[%s3789_s14 + $0x18] sm:$0xff] %v560_v3  ;;  %v578_v22 = vld [vmem:[%s3746_s4 + $0xa8] sm:$0xff]  ;;  %v579_v23 = vld [vmem:[%s3746_s4 + $0xb0] sm:$0xff] }
  0xb1   : > { %593 = vst [vmem:[%s3789_s14 + $0x20] sm:$0xff] %v561_v4  ;;  %594 = vst [vmem:[%s3789_s14 + $0x28] sm:$0xff] %v562_v5  ;;  %v580_v24 = vld [vmem:[%s3746_s4 + $0xb8] sm:$0xff]  ;;  %v581_v25 = vld [vmem:[%s3746_s4 + $0xc0] sm:$0xff] }
  0xb2   : > { %595 = vst [vmem:[%s3789_s14 + $0x30] sm:$0xff] %v563_v7  ;;  %596 = vst [vmem:[%s3789_s14 + $0x38] sm:$0xff] %v564_v8  ;;  %v582_v26 = vld [vmem:[%s3746_s4 + $0xc8] sm:$0xff]  ;;  %v583_v27 = vld [vmem:[%s3746_s4 + $0xd0] sm:$0xff] }
  0xb3   : > { %597 = vst [vmem:[%s3789_s14 + $0x40] sm:$0xff] %v565_v9  ;;  %598 = vst [vmem:[%s3789_s14 + $0x48] sm:$0xff] %v566_v10  ;;  %v584_v28 = vld [vmem:[%s3746_s4 + $0xd8] sm:$0xff]  ;;  %v585_v29 = vld [vmem:[%s3746_s4 + $0xe0] sm:$0xff] }
  0xb4   : > { %599 = vst [vmem:[%s3789_s14 + $0x50] sm:$0xff] %v567_v11  ;;  %600 = vst [vmem:[%s3789_s14 + $0x58] sm:$0xff] %v568_v12  ;;  %v586_v30 = vld [vmem:[%s3746_s4 + $0xe8] sm:$0xff]  ;;  %v587_v31 = vld [vmem:[%s3746_s4 + $0xf0] sm:$0xff] }
  0xb5   : > { %601 = vst [vmem:[%s3789_s14 + $0x60] sm:$0xff] %v569_v13  ;;  %602 = vst [vmem:[%s3789_s14 + $0x68] sm:$0xff] %v570_v14  ;;  %v588_v32 = vld [vmem:[%s3746_s4 + $0xf8] sm:$0xff] }
  0xb6   : > { %603 = vst [vmem:[%s3789_s14 + $0x70] sm:$0xff] %v571_v15  ;;  %604 = vst [vmem:[%s3789_s14 + $0x78] sm:$0xff] %v572_v16 }
  0xb7   : > { %605 = vst [vmem:[%s3789_s14 + $0x80] sm:$0xff] %v573_v17  ;;  %606 = vst [vmem:[%s3789_s14 + $0x88] sm:$0xff] %v574_v18 }
  0xb8   : > { %607 = vst [vmem:[%s3789_s14 + $0x90] sm:$0xff] %v575_v19  ;;  %608 = vst [vmem:[%s3789_s14 + $0x98] sm:$0xff] %v576_v20 }
  0xb9   : > { %609 = vst [vmem:[%s3789_s14 + $0xa0] sm:$0xff] %v577_v21  ;;  %610 = vst [vmem:[%s3789_s14 + $0xa8] sm:$0xff] %v578_v22 }
  0xba   : > { %611 = vst [vmem:[%s3789_s14 + $0xb0] sm:$0xff] %v579_v23  ;;  %612 = vst [vmem:[%s3789_s14 + $0xb8] sm:$0xff] %v580_v24 }
  0xbb   : > { %613 = vst [vmem:[%s3789_s14 + $0xc0] sm:$0xff] %v581_v25  ;;  %614 = vst [vmem:[%s3789_s14 + $0xc8] sm:$0xff] %v582_v26 }
  0xbc   : > { %615 = vst [vmem:[%s3789_s14 + $0xd0] sm:$0xff] %v583_v27  ;;  %616 = vst [vmem:[%s3789_s14 + $0xd8] sm:$0xff] %v584_v28 }
  0xbd   : > { %617 = vst [vmem:[%s3789_s14 + $0xe0] sm:$0xff] %v585_v29  ;;  %618 = vst [vmem:[%s3789_s14 + $0xe8] sm:$0xff] %v586_v30 }
  0xbe   : > { %619 = vst [vmem:[%s3789_s14 + $0xf0] sm:$0xff] %v587_v31  ;;  %620 = vst [vmem:[%s3789_s14 + $0xf8] sm:$0xff] %v588_v32 }
  0xbf PF: > { %v701_v33 = vld [vmem:[%s3754_s5 + $0xf8] sm:$0xff]  ;;  %v700_v34 = vld [vmem:[%s3754_s5 + $0xf0] sm:$0xff]  ;;  %v699_v35 = vld [vmem:[%s3754_s5 + $0xe8] sm:$0xff]  ;;  %v3447_v37 = vmov 0.0   ;;  %s4591_s18 = sld [smem:[#allocation20_spill]]  ;;  %s2131_s20 = sshll.u32 %s3789_s14, 4  ;;  %s4395_s20 = int_to_ptr.vmem [resolvable:$true] %s2131_s20 }
  0xc0   : > { %748 = vmatprep.subr.mxu0 %v701_v33  ;;  %v698_v36 = vld [vmem:[%s3754_s5 + $0xe0] sm:$0xff]  ;;  %812 = vmatprep.mubr.f32.mxu0 %v3447_v37  ;;  %v697_v38 = vld [vmem:[%s3754_s5 + $0xd8] sm:$0xff]  ;;  %v696_v39 = vld [vmem:[%s3754_s5 + $0xd0] sm:$0xff]  ;;  %s4593_s7 = sld [smem:[#allocation33_spill]]  ;;  %s2112_s1 = scalar_lea.sflag [#allocation4], %s3740_s10 }
  0xc1   : > { %749 = vmatpush1.msra.mxu0 %v700_v34  ;;  %v695_v40 = vld [vmem:[%s3754_s5 + $0xc8] sm:$0xff]  ;;  %v694_v41 = vld [vmem:[%s3754_s5 + $0xc0] sm:$0xff]  ;;  %v693_v42 = vld [vmem:[%s3754_s5 + $0xb8] sm:$0xff]  ;;  %s3305_s21 = scalar_lea.vmem %s4395_s20, 4096  ;;  %s3448_s11 = smov [#allocation11]  }
  0xc2   : > { %750 = vmatprep.subr.mxu0 %v699_v35  ;;  %v692_v43 = vld [vmem:[%s3754_s5 + $0xb0] sm:$0xff]  ;;  %v691_v44 = vld [vmem:[%s3754_s5 + $0xa8] sm:$0xff]  ;;  %v690_v45 = vld [vmem:[%s3754_s5 + $0xa0] sm:$0xff]  ;;  %v738_v35 = vlaneseq  ;;  %p3306_p2 = scmp.ne.s32.totalorder %s4395_s20, %s3305_s21  ;;  %s3309_s22 = sshll.u32 %s3448_s11, 4  ;;  %s3310_s22 = int_to_ptr.vmem [resolvable:$false] %s3309_s22 }
  0xc3   : > { %751 = vmatpush1.msra.mxu0 %v698_v36  ;;  %v689_v46 = vld [vmem:[%s3754_s5 + $0x98] sm:$0xff]  ;;  %v688_v47 = vld [vmem:[%s3754_s5 + $0x90] sm:$0xff]  ;;  %v687_v48 = vld [vmem:[%s3754_s5 + $0x88] sm:$0xff]  ;;  %p3312_p5 = scmp.lt.s32.totalorder %s4395_s20, %s3310_s22 }
  0xc4   : > { %752 = vmatprep.subr.mxu0 %v697_v38  ;;  %v686_v49 = vld [vmem:[%s3754_s5 + $0x80] sm:$0xff]  ;;  %v685_v50 = vld [vmem:[%s3754_s5 + $0x78] sm:$0xff]  ;;  %v684_v51 = vld [vmem:[%s3754_s5 + $0x70] sm:$0xff]  ;;  %v3970_v36 = vshrl.u32 %v738_v35, 7  ;;  %p3307_p8 = pnand %p3306_p2, %p3678_p0 }
  0xc5   : > { %753 = vmatpush1.msra.mxu0 %v696_v39  ;;  %v683_v52 = vld [vmem:[%s3754_s5 + $0x68] sm:$0xff]  ;;  %v718_v53 = vld [vmem:[%s3762_s16 + $0x78] sm:$0xff]  ;;  %v717_v54 = vld [vmem:[%s3762_s16 + $0x70] sm:$0xff]  ;;  %s2472_s4 = sshll.u32 %s4591_s18, 12 }
  0xc6   : > { %754 = vmatprep.subr.mxu0 %v695_v40  ;;  %v682_v55 = vld [vmem:[%s3754_s5 + $0x60] sm:$0xff]  ;;  %2601 = vmatprep.subr.mxu1 %v718_v53  ;;  %v681_v56 = vld [vmem:[%s3754_s5 + $0x58] sm:$0xff]  ;;  %v716_v57 = vld [vmem:[%s3762_s16 + $0x68] sm:$0xff]  ;;  %v740_v38 = vsub.s32 0, %v3970_v36  ;;  %s4393_s0 = scalar_lea.hbm %s4593_s7, %s2472_s4  ;;  %p3308_p3 = pneg %p3307_p8 }
  0xc7   : > { %755 = vmatpush1.msra.mxu0 %v694_v41  ;;  %2602 = vmatpush3.msra.mxu1 %v718_v53  ;;  %v680_v58 = vld [vmem:[%s3754_s5 + $0x50] sm:$0xff]  ;;  %v679_v59 = vld [vmem:[%s3754_s5 + $0x48] sm:$0xff]  ;;  %v678_v61 = vld [vmem:[%s3754_s5 + $0x40] sm:$0xff] }
  0xc8   : > { %756 = vmatprep.subr.mxu0 %v693_v42  ;;  %2603 = vmatprep.subr.mxu1 %v717_v54  ;;  %v715_v60 = vld [vmem:[%s3762_s16 + $0x60] sm:$0xff]  ;;  %v677_v62 = vld [vmem:[%s3754_s5 + $0x38] sm:$0xff]  ;;  %v714_v63 = vld [vmem:[%s3762_s16 + $0x58] sm:$0xff] }
  0xc9   : > { %757 = vmatpush1.msra.mxu0 %v692_v43  ;;  %2604 = vmatpush3.msra.mxu1 %v717_v54  ;;  %v676_v0 = vld [vmem:[%s3754_s5 + $0x30] sm:$0xff]  ;;  %v675_v1 = vld [vmem:[%s3754_s5 + $0x28] sm:$0xff]  ;;  %v713_v2 = vld [vmem:[%s3762_s16 + $0x50] sm:$0xff] }
  0xca   : > { %758 = vmatprep.subr.mxu0 %v691_v44  ;;  %2605 = vmatprep.subr.mxu1 %v716_v57  ;;  %v674_v3 = vld [vmem:[%s3754_s5 + $0x20] sm:$0xff]  ;;  %v673_v4 = vld [vmem:[%s3754_s5 + $0x18] sm:$0xff]  ;;  %v672_v5 = vld [vmem:[%s3754_s5 + $0x10] sm:$0xff] }
  0xcb   : > { %759 = vmatpush1.msra.mxu0 %v690_v45  ;;  %2606 = vmatpush3.msra.mxu1 %v716_v57  ;;  %v671_v6 = vld [vmem:[%s3754_s5 + $0x8] sm:$0xff]  ;;  %v670_v7 = vld [vmem:[%s3754_s5] sm:$0xff]  ;;  %v640_v9 = vld [vmem:[%s3789_s14 + $0x10] sm:$0xff] }
  0xcc   : > { %760 = vmatprep.subr.mxu0 %v689_v46  ;;  %2607 = vmatprep.subr.mxu1 %v715_v60  ;;  %v638_v8 = vld [vmem:[%s3789_s14] sm:$0xff]  ;;  %v644_v11 = vld [vmem:[%s3789_s14 + $0x30] sm:$0xff]  ;;  %v712_v24 = vld [vmem:[%s3762_s16 + $0x48] sm:$0xff] }
  0xcd   : > { %761 = vmatpush1.msra.mxu0 %v688_v47  ;;  %2608 = vmatpush3.msra.mxu1 %v715_v60  ;;  %v642_v10 = vld [vmem:[%s3789_s14 + $0x20] sm:$0xff]  ;;  %v648_v13 = vld [vmem:[%s3789_s14 + $0x50] sm:$0xff]  ;;  %v710_v26 = vld [vmem:[%s3762_s16 + $0x38] sm:$0xff] }
  0xce   : > { %762 = vmatprep.subr.mxu0 %v687_v48  ;;  %2609 = vmatprep.subr.mxu1 %v714_v63  ;;  %v646_v12 = vld [vmem:[%s3789_s14 + $0x40] sm:$0xff]  ;;  %v652_v15 = vld [vmem:[%s3789_s14 + $0x70] sm:$0xff]  ;;  %v708_v28 = vld [vmem:[%s3762_s16 + $0x28] sm:$0xff] }
  0xcf   : > { %763 = vmatpush1.msra.mxu0 %v686_v49  ;;  %2610 = vmatpush3.msra.mxu1 %v714_v63  ;;  %v650_v14 = vld [vmem:[%s3789_s14 + $0x60] sm:$0xff]  ;;  %v656_v17 = vld [vmem:[%s3789_s14 + $0x90] sm:$0xff]  ;;  %v706_v30 = vld [vmem:[%s3762_s16 + $0x18] sm:$0xff] }
  0xd0   : > { %764 = vmatprep.subr.mxu0 %v685_v50  ;;  %2611 = vmatprep.subr.mxu1 %v713_v2  ;;  %v654_v16 = vld [vmem:[%s3789_s14 + $0x80] sm:$0xff]  ;;  %v660_v19 = vld [vmem:[%s3789_s14 + $0xb0] sm:$0xff]  ;;  %v704_v32 = vld [vmem:[%s3762_s16 + $0x8] sm:$0xff] }
  0xd1   : > { %765 = vmatpush1.msra.mxu0 %v684_v51  ;;  %2612 = vmatpush3.msra.mxu1 %v713_v2  ;;  %v658_v18 = vld [vmem:[%s3789_s14 + $0xa0] sm:$0xff]  ;;  %v664_v21 = vld [vmem:[%s3789_s14 + $0xd0] sm:$0xff]  ;;  %v735_v34 = vld [vmem:[%s3785_s17 + $0x78] sm:$0xff] }
  0xd2   : > { %766 = vmatprep.subr.mxu0 %v683_v52  ;;  %v662_v20 = vld [vmem:[%s3789_s14 + $0xc0] sm:$0xff]  ;;  %v668_v23 = vld [vmem:[%s3789_s14 + $0xf0] sm:$0xff]  ;;  %2613 = vmatprep.subr.mxu1 %v712_v24  ;;  %v3974_v39 = vld [vmem:[%s3760_s28] sm:$0x3] }
  0xd3   : > { %767 = vmatpush1.msra.mxu0 %v682_v55  ;;  %v666_v22 = vld [vmem:[%s3789_s14 + $0xe0] sm:$0xff]  ;;  %2614 = vmatpush3.msra.mxu1 %v712_v24  ;;  %v709_v27 = vld [vmem:[%s3762_s16 + $0x30] sm:$0xff]  ;;  %v3979_v40 = vrot.slane %v3974_v39, %v740_v38 }
  0xd4   : > { %768 = vmatprep.subr.mxu0 %v681_v56  ;;  %v711_v25 = vld [vmem:[%s3762_s16 + $0x40] sm:$0xff]  ;;  %v705_v31 = vld [vmem:[%s3762_s16 + $0x10] sm:$0xff] }
  0xd5   : > { %769 = vmatpush1.msra.mxu0 %v680_v58  ;;  %2615 = vmatprep.subr.mxu1 %v711_v25  ;;  %v707_v29 = vld [vmem:[%s3762_s16 + $0x20] sm:$0xff] }
  0xd6   : > { %770 = vmatprep.subr.mxu0 %v679_v59  ;;  %2616 = vmatpush3.msra.mxu1 %v711_v25  ;;  %v703_v33 = vld [vmem:[%s3762_s16] sm:$0xff]  ;;  %v734_v59 = vld [vmem:[%s3785_s17 + $0x70] sm:$0xff] }
  0xd7   : > { %771 = vmatpush1.msra.mxu0 %v678_v61  ;;  %2617 = vmatprep.subr.mxu1 %v710_v26  ;;  %v724_v25 = vld [vmem:[%s3785_s17 + $0x20] sm:$0xff] }
  0xd8   : > { %772 = vmatprep.subr.mxu0 %v677_v62  ;;  %2618 = vmatpush3.msra.mxu1 %v710_v26  ;;  %v733_v62 = vld [vmem:[%s3785_s17 + $0x68] sm:$0xff] }
  0xd9   : > { %773 = vmatpush1.msra.mxu0 %v676_v0  ;;  %2619 = vmatprep.subr.mxu1 %v709_v27 }
  0xda   : > { %774 = vmatprep.subr.mxu0 %v675_v1  ;;  %2620 = vmatpush3.msra.mxu1 %v709_v27  ;;  %v732_v1 = vld [vmem:[%s3785_s17 + $0x60] sm:$0xff] }
  0xdb   : > { %775 = vmatpush1.msra.mxu0 %v674_v3  ;;  %2621 = vmatprep.subr.mxu1 %v708_v28 }
  0xdc   : > { %776 = vmatprep.subr.mxu0 %v673_v4  ;;  %2622 = vmatpush3.msra.mxu1 %v708_v28  ;;  %v731_v4 = vld [vmem:[%s3785_s17 + $0x58] sm:$0xff] }
  0xdd   : > { %777 = vmatpush1.msra.mxu0 %v672_v5  ;;  %2623 = vmatprep.subr.mxu1 %v707_v29  ;;  %v723_v28 = vld [vmem:[%s3785_s17 + $0x18] sm:$0xff] }
  0xde   : > { %778 = vmatprep.subr.mxu0 %v671_v6  ;;  %2624 = vmatpush3.msra.mxu1 %v707_v29 }
  0xdf   : > { %779 = vmatpush1.msra.mxu0 %v670_v7  ;;  %2625 = vmatprep.subr.mxu1 %v706_v30  ;;  %v730_v7 = vld [vmem:[%s3785_s17 + $0x50] sm:$0xff] }
  0xe0   : > { %813 = vmatmul.mubr.f32.vlgmr.msra.gmra.mxu0 %v638_v8  ;;  %2626 = vmatpush3.msra.mxu1 %v706_v30 }
  0xe1   : > { %818 = vmatprep.mubr.f32.mxu0 %v3447_v37  ;;  %2627 = vmatprep.subr.mxu1 %v705_v31 }
  0xe2   : > { %2628 = vmatpush3.msra.mxu1 %v705_v31  ;;  %v722_v31 = vld [vmem:[%s3785_s17 + $0x10] sm:$0xff] }
  0xe3   : > { %2629 = vmatprep.subr.mxu1 %v704_v32 }
  0xe4   : > { %819 = vmatmul.mubr.f32.gmra.mxu0 %v640_v9  ;;  %2630 = vmatpush3.msra.mxu1 %v704_v32 }
  0xe5   : > { %824 = vmatprep.mubr.f32.mxu0 %v3447_v37  ;;  %2631 = vmatprep.subr.mxu1 %v703_v33 }
  0xe6   : > { %2632 = vmatpush3.msra.mxu1 %v703_v33 }
  0xe7   : > { %2657 = vmatprep.subr.mxu1 %v735_v34 }
  0xe8   : > { %825 = vmatmul.mubr.f32.gmra.mxu0 %v642_v10  ;;  %v729_v10 = vld [vmem:[%s3785_s17 + $0x48] sm:$0xff] }
  0xe9   : > { %830 = vmatprep.mubr.f32.mxu0 %v3447_v37 }
  0xec   : > { %831 = vmatmul.mubr.f32.gmra.mxu0 %v644_v11 }
  0xed   : > { %836 = vmatprep.mubr.f32.mxu0 %v3447_v37 }
  0xf0   : > { %837 = vmatmul.mubr.f32.gmra.mxu0 %v646_v12 }
  0xf1   : > { %842 = vmatprep.mubr.f32.mxu0 %v3447_v37 }
  0xf4   : > { %843 = vmatmul.mubr.f32.gmra.mxu0 %v648_v13  ;;  %v728_v13 = vld [vmem:[%s3785_s17 + $0x40] sm:$0xff] }
  0xf5   : > { %848 = vmatprep.mubr.f32.mxu0 %v3447_v37 }
  0xf8   : > { %849 = vmatmul.mubr.f32.gmra.mxu0 %v650_v14 }
  0xf9   : > { %854 = vmatprep.mubr.f32.mxu0 %v3447_v37 }
  0xfc   : > { %855 = vmatmul.mubr.f32.gmra.mxu0 %v652_v15 }
  0xfd   : > { %860 = vmatprep.mubr.f32.mxu0 %v3447_v37 }
 0x100   : > { %861 = vmatmul.mubr.f32.gmra.mxu0 %v654_v16  ;;  %v727_v16 = vld [vmem:[%s3785_s17 + $0x38] sm:$0xff] }
 0x101   : > { %866 = vmatprep.mubr.f32.mxu0 %v3447_v37 }
 0x104   : > { %867 = vmatmul.mubr.f32.gmra.mxu0 %v656_v17 }
 0x105   : > { %872 = vmatprep.mubr.f32.mxu0 %v3447_v37 }
 0x108   : > { %873 = vmatmul.mubr.f32.gmra.mxu0 %v658_v18 }
 0x109   : > { %878 = vmatprep.mubr.f32.mxu0 %v3447_v37 }
 0x10c   : > { %879 = vmatmul.mubr.f32.gmra.mxu0 %v660_v19  ;;  %v726_v19 = vld [vmem:[%s3785_s17 + $0x30] sm:$0xff] }
 0x10d   : > { %884 = vmatprep.mubr.f32.mxu0 %v3447_v37 }
 0x110   : > { %885 = vmatmul.mubr.f32.gmra.mxu0 %v662_v20 }
 0x111   : > { %890 = vmatprep.mubr.f32.mxu0 %v3447_v37 }
 0x114   : > { %891 = vmatmul.mubr.f32.gmra.mxu0 %v664_v21 }
 0x115   : > { %896 = vmatprep.mubr.f32.mxu0 %v3447_v37 }
 0x118   : > { %897 = vmatmul.mubr.f32.gmra.mxu0 %v666_v22  ;;  %v725_v22 = vld [vmem:[%s3785_s17 + $0x28] sm:$0xff] }
 0x119   : > { %902 = vmatprep.mubr.f32.mxu0 %v3447_v37 }
 0x11c   : > { %903 = vmatmul.mubr.f32.gmra.mxu0 %v668_v23 }
 0x11d   : > { %1487 = vmatprep.mubr.f32.mxu0 %v3447_v37 }
 0x1a0   : > { %v814_v41 = vpop.f32.mrf.mxu0 }
 0x1a1   : > { %v815_v42 = vadd.f32 %v814_v41, %v3979_v40 }
 0x1a2   : > { %v3982_v43 = vpop.f32.mrf.mxu0 }
 0x1a3   : > { %2957 = vtanh.f32 %v815_v42  ;;  %v720_v42 = vld [vmem:[%s3785_s17] sm:$0xff] }
 0x1a4   : > { %v820_v44 = vpop.f32.mrf.mxu0 }
 0x1a5   : > { %v821_v45 = vadd.f32 %v820_v44, %v3979_v40 }
 0x1a6   : > { %v3985_v46 = vpop.f32.mrf.mxu0 }
 0x1a7   : > { %2959 = vtanh.f32 %v821_v45 }
 0x1a8   : > { %v826_v47 = vpop.f32.mrf.mxu0 }
 0x1a9   : > { %v827_v48 = vadd.f32 %v826_v47, %v3979_v40 }
 0x1aa   : > { %v3988_v49 = vpop.f32.mrf.mxu0 }
 0x1ab   : > { %2961 = vtanh.f32 %v827_v48  ;;  %v744_v48 = vsub.s32 1, %v3970_v36 }
 0x1ac   : > { %v832_v50 = vpop.f32.mrf.mxu0 }
 0x1ad   : > { %v833_v51 = vadd.f32 %v832_v50, %v3979_v40 }
 0x1ae   : > { %v3991_v52 = vpop.f32.mrf.mxu0 }
 0x1af   : > { %2963 = vtanh.f32 %v833_v51 }
 0x1b0   : > { %v2958_v53 = vpop.eup %2957  ;;  %v838_v54 = vpop.f32.mrf.mxu0 }
 0x1b1   : > { %v839_v55 = vadd.f32 %v838_v54, %v3979_v40  ;;  %2633 = vmatprep.mubr.f32.mxu1 %v2958_v53 }
 0x1b2   : > { %v3994_v56 = vpop.f32.mrf.mxu0 }
 0x1b3   : > { %2965 = vtanh.f32 %v839_v55  ;;  %v4038_v55 = vrot.slane %v3974_v39, %v744_v48 }
 0x1b4   : > { %v2960_v57 = vpop.eup %2959  ;;  %v844_v58 = vpop.f32.mrf.mxu0 }
 0x1b5   : > { %v845_v60 = vadd.f32 %v844_v58, %v3979_v40  ;;  %2634 = vmatmul.mubr.f32.vlgmr.msra.gmra.mxu1 %v2960_v57 }
 0x1b6   : > { %v3998_v61 = vpop.f32.mrf.mxu0  ;;  %2658 = vmatpush3.msra.mxu1 %v735_v34  ;;  %v721_v34 = vld [vmem:[%s3785_s17 + $0x8] sm:$0xff] }
 0x1b7   : > { %2967 = vtanh.f32 %v845_v60  ;;  %2659 = vmatprep.subr.mxu1 %v734_v59 }
 0x1b8   : > { %v2962_v63 = vpop.eup %2961  ;;  %v850_v0 = vpop.f32.mrf.mxu0  ;;  %2660 = vmatpush3.msra.mxu1 %v734_v59 }
 0x1b9   : > { %v851_v2 = vadd.f32 %v850_v0, %v3979_v40  ;;  %2636 = vmatprep.mubr.f32.mxu1 %v2962_v63  ;;  %2661 = vmatprep.subr.mxu1 %v733_v62 }
 0x1ba   : > { %v4003_v3 = vpop.f32.mrf.mxu0  ;;  %2662 = vmatpush3.msra.mxu1 %v733_v62  ;;  %v817_v62 = vadd.f32 %v3982_v43, %v4038_v55  ;;  %v847_v43 = vadd.f32 %v3998_v61, %v4038_v55 }
 0x1bb   : > { %2969 = vtanh.f32 %v851_v2  ;;  %2663 = vmatprep.subr.mxu1 %v732_v1  ;;  %v829_v2 = vadd.f32 %v3988_v49, %v4038_v55  ;;  %v853_v49 = vadd.f32 %v4003_v3, %v4038_v55 }
 0x1bc   : > { %v2964_v5 = vpop.eup %2963  ;;  %v856_v6 = vpop.f32.mrf.mxu0  ;;  %2664 = vmatpush3.msra.mxu1 %v732_v1  ;;  %v823_v1 = vadd.f32 %v3985_v46, %v4038_v55 }
 0x1bd   : > { %v857_v8 = vadd.f32 %v856_v6, %v3979_v40  ;;  %2637 = vmatmul.mubr.f32.gmra.mxu1 %v2964_v5  ;;  %2665 = vmatprep.subr.mxu1 %v731_v4 }
 0x1be   : > { %v4008_v9 = vpop.f32.mrf.mxu0  ;;  %2666 = vmatpush3.msra.mxu1 %v731_v4  ;;  %v835_v4 = vadd.f32 %v3991_v52, %v4038_v55 }
 0x1bf   : > { %2971 = vtanh.f32 %v857_v8  ;;  %2667 = vmatprep.subr.mxu1 %v730_v7  ;;  %v859_v52 = vadd.f32 %v4008_v9, %v4038_v55 }
 0x1c0   : > { %v2966_v11 = vpop.eup %2965  ;;  %v862_v12 = vpop.f32.mrf.mxu0  ;;  %2668 = vmatpush3.msra.mxu1 %v730_v7 }
 0x1c1   : > { %v863_v14 = vadd.f32 %v862_v12, %v3979_v40  ;;  %2639 = vmatprep.mubr.f32.mxu1 %v2966_v11  ;;  %2669 = vmatprep.subr.mxu1 %v729_v10 }
 0x1c2   : > { %v4013_v15 = vpop.f32.mrf.mxu0  ;;  %2670 = vmatpush3.msra.mxu1 %v729_v10 }
 0x1c3   : > { %2973 = vtanh.f32 %v863_v14  ;;  %2671 = vmatprep.subr.mxu1 %v728_v13 }
 0x1c4   : > { %v2968_v17 = vpop.eup %2967  ;;  %v868_v18 = vpop.f32.mrf.mxu0  ;;  %2672 = vmatpush3.msra.mxu1 %v728_v13 }
 0x1c5   : > { %v869_v20 = vadd.f32 %v868_v18, %v3979_v40  ;;  %2640 = vmatmul.mubr.f32.gmra.mxu1 %v2968_v17  ;;  %2673 = vmatprep.subr.mxu1 %v727_v16 }
 0x1c6   : > { %v4018_v21 = vpop.f32.mrf.mxu0  ;;  %2674 = vmatpush3.msra.mxu1 %v727_v16 }
 0x1c7   : > { %2975 = vtanh.f32 %v869_v20  ;;  %2675 = vmatprep.subr.mxu1 %v726_v19  ;;  %v871_v61 = vadd.f32 %v4018_v21, %v4038_v55  ;;  %v2417_v21 = vld [vmem:[%s3754_s5 + $0x1f8] sm:$0xff] }
 0x1c8   : > { %v2970_v23 = vpop.eup %2969  ;;  %v874_v24 = vpop.f32.mrf.mxu0  ;;  %2676 = vmatpush3.msra.mxu1 %v726_v19  ;;  %1423 = vmatprep.subr.mxu0 %v2417_v21 }
 0x1c9   : > { %v875_v26 = vadd.f32 %v874_v24, %v3979_v40  ;;  %2642 = vmatprep.mubr.f32.mxu1 %v2970_v23  ;;  %2677 = vmatprep.subr.mxu1 %v725_v22  ;;  %v2415_v23 = vld [vmem:[%s3754_s5 + $0x1e8] sm:$0xff] }
 0x1ca   : > { %v4023_v27 = vpop.f32.mrf.mxu0  ;;  %2678 = vmatpush3.msra.mxu1 %v725_v22  ;;  %v2416_v22 = vld [vmem:[%s3754_s5 + $0x1f0] sm:$0xff] }
 0x1cb   : > { %2977 = vtanh.f32 %v875_v26  ;;  %2679 = vmatprep.subr.mxu1 %v724_v25  ;;  %v877_v3 = vadd.f32 %v4023_v27, %v4038_v55  ;;  %1424 = vmatpush1.msra.mxu0 %v2416_v22 }
 0x1cc   : > { %v2972_v29 = vpop.eup %2971  ;;  %v880_v30 = vpop.f32.mrf.mxu0  ;;  %2680 = vmatpush3.msra.mxu1 %v724_v25  ;;  %v2414_v25 = vld [vmem:[%s3754_s5 + $0x1e0] sm:$0xff]  ;;  %1425 = vmatprep.subr.mxu0 %v2415_v23 }
 0x1cd   : > { %v881_v32 = vadd.f32 %v880_v30, %v3979_v40  ;;  %2643 = vmatmul.mubr.f32.gmra.mxu1 %v2972_v29  ;;  %2681 = vmatprep.subr.mxu1 %v723_v28  ;;  %v2413_v29 = vld [vmem:[%s3754_s5 + $0x1d8] sm:$0xff]  ;;  %v2412_v30 = vld [vmem:[%s3754_s5 + $0x1d0] sm:$0xff] }
 0x1ce   : > { %v4028_v33 = vpop.f32.mrf.mxu0  ;;  %2682 = vmatpush3.msra.mxu1 %v723_v28  ;;  %1426 = vmatpush1.msra.mxu0 %v2414_v25 }
 0x1cf   : > { %2979 = vtanh.f32 %v881_v32  ;;  %2683 = vmatprep.subr.mxu1 %v722_v31  ;;  %v883_v9 = vadd.f32 %v4028_v33, %v4038_v55  ;;  %1427 = vmatprep.subr.mxu0 %v2413_v29  ;;  %v2410_v33 = vld [vmem:[%s3754_s5 + $0x1c0] sm:$0xff] }
 0x1d0   : > { %v2974_v35 = vpop.eup %2973  ;;  %v886_v41 = vpop.f32.mrf.mxu0  ;;  %2684 = vmatpush3.msra.mxu1 %v722_v31  ;;  %v2411_v31 = vld [vmem:[%s3754_s5 + $0x1c8] sm:$0xff]  ;;  %1428 = vmatpush1.msra.mxu0 %v2412_v30 }
 0x1d1   : > { %v887_v44 = vadd.f32 %v886_v41, %v3979_v40  ;;  %2645 = vmatprep.mubr.f32.mxu1 %v2974_v35  ;;  %2685 = vmatprep.subr.mxu1 %v721_v34 }
 0x1d2   : > { %v888_v45 = vpop.f32.mrf.mxu0  ;;  %2686 = vmatpush3.msra.mxu1 %v721_v34  ;;  %1429 = vmatprep.subr.mxu0 %v2411_v31 }
 0x1d3   : > { %2981 = vtanh.f32 %v887_v44  ;;  %2687 = vmatprep.subr.mxu1 %v720_v42  ;;  %v889_v12 = vadd.f32 %v888_v45, %v4038_v55  ;;  %1430 = vmatpush1.msra.mxu0 %v2410_v33  ;;  %v2408_v44 = vld [vmem:[%s3754_s5 + $0x1b0] sm:$0xff]  ;;  %v2407_v45 = vld [vmem:[%s3754_s5 + $0x1a8] sm:$0xff] }
 0x1d4   : > { %v2976_v47 = vpop.eup %2975  ;;  %v892_v50 = vpop.f32.mrf.mxu0  ;;  %2688 = vmatpush3.msra.mxu1 %v720_v42  ;;  %v2409_v42 = vld [vmem:[%s3754_s5 + $0x1b8] sm:$0xff] }
 0x1d5   : > { %v893_v51 = vadd.f32 %v892_v50, %v3979_v40  ;;  %2646 = vmatmul.mubr.f32.gmra.mxu1 %v2976_v47  ;;  %1431 = vmatprep.subr.mxu0 %v2409_v42  ;;  %v2406_v47 = vld [vmem:[%s3754_s5 + $0x1a0] sm:$0xff]  ;;  %v2405_v50 = vld [vmem:[%s3754_s5 + $0x198] sm:$0xff] }
 0x1d6   : > { %v894_v53 = vpop.f32.mrf.mxu0  ;;  %1432 = vmatpush1.msra.mxu0 %v2408_v44 }
 0x1d7   : > { %2983 = vtanh.f32 %v893_v51  ;;  %v895_v14 = vadd.f32 %v894_v53, %v4038_v55  ;;  %1433 = vmatprep.subr.mxu0 %v2407_v45  ;;  %v2404_v51 = vld [vmem:[%s3754_s5 + $0x190] sm:$0xff]  ;;  %v2403_v53 = vld [vmem:[%s3754_s5 + $0x188] sm:$0xff] }
 0x1d8   : > { %v2978_v54 = vpop.eup %2977  ;;  %v898_v57 = vpop.f32.mrf.mxu0  ;;  %1434 = vmatpush1.msra.mxu0 %v2406_v47 }
 0x1d9   : > { %v899_v58 = vadd.f32 %v898_v57, %v3979_v40  ;;  %2648 = vmatprep.mubr.f32.mxu1 %v2978_v54  ;;  %1435 = vmatprep.subr.mxu0 %v2405_v50  ;;  %v2402_v54 = vld [vmem:[%s3754_s5 + $0x180] sm:$0xff]  ;;  %v2400_v57 = vld [vmem:[%s3754_s5 + $0x170] sm:$0xff] }
 0x1da   : > { %v900_v59 = vpop.f32.mrf.mxu0  ;;  %1436 = vmatpush1.msra.mxu0 %v2404_v51 }
 0x1db   : > { %2985 = vtanh.f32 %v899_v58  ;;  %v901_v16 = vadd.f32 %v900_v59, %v4038_v55  ;;  %1437 = vmatprep.subr.mxu0 %v2403_v53  ;;  %v2399_v58 = vld [vmem:[%s3754_s5 + $0x168] sm:$0xff]  ;;  %v2398_v59 = vld [vmem:[%s3754_s5 + $0x160] sm:$0xff] }
 0x1dc   : > { %v2980_v60 = vpop.eup %2979  ;;  %v904_v63 = vpop.f32.mrf.mxu0  ;;  %1438 = vmatpush1.msra.mxu0 %v2402_v54  ;;  %v641_v53 = vld [vmem:[%s3789_s14 + $0x18] sm:$0xff] }
 0x1dd   : > { %v905_v0 = vadd.f32 %v904_v63, %v3979_v40  ;;  %2649 = vmatmul.mubr.f32.gmra.mxu1 %v2980_v60  ;;  %v841_v40 = vadd.f32 %v3994_v56, %v4038_v55  ;;  %v865_v56 = vadd.f32 %v4013_v15, %v4038_v55  ;;  %v2397_v60 = vld [vmem:[%s3754_s5 + $0x158] sm:$0xff]  ;;  %v2395_v63 = vld [vmem:[%s3754_s5 + $0x148] sm:$0xff]  ;;  %v4122_v54 = vld [vmem:[%s3778_s19] ss:$0 sm:$0xff] }
 0x1de   : > { %v906_v17 = vpop.f32.mrf.mxu0 }
 0x1df   : > { %2987 = vtanh.f32 %v905_v0  ;;  %v907_v19 = vadd.f32 %v906_v17, %v4038_v55  ;;  %v2401_v55 = vld [vmem:[%s3754_s5 + $0x178] sm:$0xff]  ;;  %v2394_v0 = vld [vmem:[%s3754_s5 + $0x140] sm:$0xff] }
 0x1e0   : > { %v2982_v39 = vpop.eup %2981  ;;  %2989 = vtanh.f32 %v817_v62  ;;  %1439 = vmatprep.subr.mxu0 %v2401_v55  ;;  %v2396_v62 = vld [vmem:[%s3754_s5 + $0x150] sm:$0xff] }
 0x1e1   : > { %2651 = vmatprep.mubr.f32.mxu1 %v2982_v39  ;;  %2991 = vtanh.f32 %v823_v1  ;;  %1440 = vmatpush1.msra.mxu0 %v2400_v57  ;;  %v2393_v1 = vld [vmem:[%s3754_s5 + $0x138] sm:$0xff]  ;;  %v2392_v39 = vld [vmem:[%s3754_s5 + $0x130] sm:$0xff] }
 0x1e2   : > { %2993 = vtanh.f32 %v829_v2  ;;  %1441 = vmatprep.subr.mxu0 %v2399_v58  ;;  %v2391_v2 = vld [vmem:[%s3754_s5 + $0x128] sm:$0xff] }
 0x1e3   : > { %2995 = vtanh.f32 %v835_v4  ;;  %1442 = vmatpush1.msra.mxu0 %v2398_v59  ;;  %v2390_v4 = vld [vmem:[%s3754_s5 + $0x120] sm:$0xff]  ;;  %v639_v59 = vld [vmem:[%s3789_s14 + $0x8] sm:$0xff] }
 0x1e4   : > { %v2984_v5 = vpop.eup %2983  ;;  %2997 = vtanh.f32 %v841_v40  ;;  %1443 = vmatprep.subr.mxu0 %v2397_v60  ;;  %v2388_v40 = vld [vmem:[%s3754_s5 + $0x110] sm:$0xff] }
 0x1e5   : > { %2652 = vmatmul.mubr.f32.gmra.mxu1 %v2984_v5  ;;  %2999 = vtanh.f32 %v847_v43  ;;  %1444 = vmatpush1.msra.mxu0 %v2396_v62  ;;  %v2389_v5 = vld [vmem:[%s3754_s5 + $0x118] sm:$0xff]  ;;  %v2387_v43 = vld [vmem:[%s3754_s5 + $0x108] sm:$0xff] }
 0x1e6   : > { %3001 = vtanh.f32 %v853_v49  ;;  %1445 = vmatprep.subr.mxu0 %v2395_v63  ;;  %v4103_v49 = vld [vmem:[%s3773_s8] ss:$0 sm:$0xff] }
 0x1e7   : > { %3003 = vtanh.f32 %v859_v52  ;;  %1446 = vmatpush1.msra.mxu0 %v2394_v0 }
 0x1e8   : > { %v2986_v46 = vpop.eup %2985  ;;  %3005 = vtanh.f32 %v865_v56  ;;  %1447 = vmatprep.subr.mxu0 %v2393_v1 }
 0x1e9   : > { %2654 = vmatprep.mubr.f32.mxu1 %v2986_v46  ;;  %3007 = vtanh.f32 %v871_v61  ;;  %1448 = vmatpush1.msra.mxu0 %v2392_v39  ;;  %v2386_v46 = vld [vmem:[%s3754_s5 + $0x100] sm:$0xff] }
 0x1ea   : > { %3009 = vtanh.f32 %v877_v3  ;;  %1449 = vmatprep.subr.mxu0 %v2391_v2  ;;  %v645_v39 = vld [vmem:[%s3789_s14 + $0x38] sm:$0xff] }
 0x1eb   : > { %3011 = vtanh.f32 %v883_v9  ;;  %1450 = vmatpush1.msra.mxu0 %v2390_v4 }
 0x1ec   : > { %v2988_v6 = vpop.eup %2987  ;;  %3013 = vtanh.f32 %v889_v12  ;;  %1451 = vmatprep.subr.mxu0 %v2389_v5 }
 0x1ed   : > { %v2990_v7 = vpop.eup %2989  ;;  %2655 = vmatmul.mubr.f32.gmra.mxu1 %v2988_v6  ;;  %3015 = vtanh.f32 %v895_v14  ;;  %1452 = vmatpush1.msra.mxu0 %v2388_v40 }
 0x1ee   : > { %2689 = vmatprep.mubr.f32.mxu1 %v2990_v7  ;;  %v2992_v8 = vpop.eup %2991  ;;  %3017 = vtanh.f32 %v901_v16  ;;  %1453 = vmatprep.subr.mxu0 %v2387_v43 }
 0x1ef   : > { %v2994_v10 = vpop.eup %2993  ;;  %3019 = vtanh.f32 %v907_v19  ;;  %1454 = vmatpush1.msra.mxu0 %v2386_v46 }
 0x1f0   : > { %v2996_v11 = vpop.eup %2995 }
 0x1f1   : > { %2690 = vmatmul.mubr.f32.vlgmr.msra.gmra.mxu1 %v2992_v8  ;;  %v2998_v13 = vpop.eup %2997 }
 0x1f2   : > { %2692 = vmatprep.mubr.f32.mxu1 %v2994_v10  ;;  %v3000_v15 = vpop.eup %2999 }
 0x1f3   : > { %v3002_v18 = vpop.eup %3001 }
 0x1f4   : > { %v3004_v20 = vpop.eup %3003 }
 0x1f5   : > { %2693 = vmatmul.mubr.f32.gmra.mxu1 %v2996_v11  ;;  %v3006_v24 = vpop.eup %3005 }
 0x1f6   : > { %2695 = vmatprep.mubr.f32.mxu1 %v2998_v13  ;;  %v3008_v26 = vpop.eup %3007 }
 0x1f7   : > { %v3010_v27 = vpop.eup %3009 }
 0x1f8   : > { %v3012_v28 = vpop.eup %3011 }
 0x1f9   : > { %2696 = vmatmul.mubr.f32.gmra.mxu1 %v3000_v15  ;;  %v3014_v32 = vpop.eup %3013 }
 0x1fa   : > { %2698 = vmatprep.mubr.f32.mxu1 %v3002_v18  ;;  %v3016_v34 = vpop.eup %3015 }
 0x1fb   : > { %v3018_v35 = vpop.eup %3017 }
 0x1fc   : > { %v3020_v41 = vpop.eup %3019 }
 0x1fd   : > { %2699 = vmatmul.mubr.f32.gmra.mxu1 %v3004_v20 }
 0x1fe   : > { %2701 = vmatprep.mubr.f32.mxu1 %v3006_v24 }
 0x201   : > { %2702 = vmatmul.mubr.f32.gmra.mxu1 %v3008_v26 }
 0x202   : > { %2704 = vmatprep.mubr.f32.mxu1 %v3010_v27 }
 0x205   : > { %2705 = vmatmul.mubr.f32.gmra.mxu1 %v3012_v28 }
 0x206   : > { %2707 = vmatprep.mubr.f32.mxu1 %v3014_v32 }
 0x209   : > { %2708 = vmatmul.mubr.f32.gmra.mxu1 %v3016_v34 }
 0x20a   : > { %2710 = vmatprep.mubr.f32.mxu1 %v3018_v35 }
 0x20d   : > { %2711 = vmatmul.mubr.f32.gmra.mxu1 %v3020_v41 }
 0x275   : > { %v2635_v52 = vpop.f32.mrf.mxu1 }
 0x276   : > { %v1019_v6 = vadd.f32 %v2635_v52, %v4103_v49 }
 0x277   : > { %v1013_v56 = vpop.f32.mrf.mxu1 }
 0x278   : > { %1309 = vadd.xlane.f32.xlu0 %v1019_v6  ;;  %v1014_v7 = vadd.f32 %v4103_v49, %v1013_v56  ;;  %v1245_v23 = vmul.f32 1.442695, %v1019_v6 }
 0x27a   : > { %v1243_v25 = vmul.f32 1.442695, %v1014_v7  ;;  %3021 = vpow2.f32 %v1245_v23 }
 0x27c   : > { %1307 = vadd.xlane.f32.xlu0 %v1014_v7  ;;  %3023 = vpow2.f32 %v1243_v25 }
 0x27d   : > { %v2638_v61 = vpop.f32.mrf.mxu1 }
 0x27e   : > { %v1029_v8 = vadd.f32 %v2638_v61, %v4103_v49 }
 0x27f   : > { %v1023_v3 = vpop.f32.mrf.mxu1 }
 0x280   : > { %1313 = vadd.xlane.f32.xlu1 %v1029_v8  ;;  %v1024_v10 = vadd.f32 %v4103_v49, %v1023_v3  ;;  %v1249_v28 = vmul.f32 1.442695, %v1029_v8  ;;  %v649_v3 = vld [vmem:[%s3789_s14 + $0x58] sm:$0xff] }
 0x282   : > { %v1247_v29 = vmul.f32 1.442695, %v1024_v10  ;;  %3025 = vpow2.f32 %v1249_v28  ;;  %v2434_v28 = vld [vmem:[%s3762_s16 + $0xf8] sm:$0xff] }
 0x283   : > { %2713 = vmatprep.subr.mxu1 %v2434_v28 }
 0x284   : > { %1311 = vadd.xlane.f32.xlu1 %v1024_v10  ;;  %3027 = vpow2.f32 %v1247_v29  ;;  %v2433_v29 = vld [vmem:[%s3762_s16 + $0xf0] sm:$0xff]  ;;  %2714 = vmatpush3.msra.mxu1 %v2434_v28 }
 0x285   : > { %v2641_v9 = vpop.f32.mrf.mxu1  ;;  %2715 = vmatprep.subr.mxu1 %v2433_v29 }
 0x286   : > { %v1039_v11 = vadd.f32 %v2641_v9, %v4103_v49  ;;  %2716 = vmatpush3.msra.mxu1 %v2433_v29 }
 0x287   : > { %v1033_v12 = vpop.f32.mrf.mxu1  ;;  %v3022_v50 = vpop.eup %3021 }
 0x288   : > { %v1034_v13 = vadd.f32 %v4103_v49, %v1033_v12  ;;  %1317 = vadd.xlane.f32.xlu1 %v1039_v11  ;;  %v1253_v30 = vmul.f32 1.442695, %v1039_v11  ;;  %v1276_v1 = vmul.f32 %v3022_v50, %v641_v53  ;;  %v2431_v53 = vld [vmem:[%s3762_s16 + $0xe0] sm:$0xff] }
 0x289   : > { %v3024_v55 = vpop.eup %3023 }
 0x28a   : > { %1315 = vadd.xlane.f32.xlu0 %v1034_v13  ;;  %v1251_v33 = vmul.f32 1.442695, %v1034_v13  ;;  %3029 = vpow2.f32 %v1253_v30  ;;  %v1275_v4 = vmul.f32 %v3024_v55, %v639_v59 }
 0x28c   : > { %3031 = vpow2.f32 %v1251_v33 }
 0x28d   : > { %v2644_v14 = vpop.f32.mrf.mxu1 }
 0x28e   : > { %v1049_v15 = vadd.f32 %v2644_v14, %v4103_v49 }
 0x28f   : > { %v1043_v16 = vpop.f32.mrf.mxu1  ;;  %v3026_v62 = vpop.eup %3025 }
 0x290   : > { %v1044_v17 = vadd.f32 %v4103_v49, %v1043_v16  ;;  %1321 = vadd.xlane.f32.xlu1 %v1049_v15  ;;  %v1257_v41 = vmul.f32 1.442695, %v1049_v15  ;;  %v1278_v6 = vmul.f32 %v3026_v62, %v645_v39  ;;  %v647_v15 = vld [vmem:[%s3789_s14 + $0x48] sm:$0xff]  ;;  %v661_v39 = vld [vmem:[%s3789_s14 + $0xb8] sm:$0xff] }
 0x291   : > { %v3028_v5 = vpop.eup %3027 }
 0x292   : > { %1319 = vadd.xlane.f32.xlu0 %v1044_v17  ;;  %v1255_v42 = vmul.f32 1.442695, %v1044_v17  ;;  %3033 = vpow2.f32 %v1257_v41  ;;  %v2432_v41 = vld [vmem:[%s3762_s16 + $0xe8] sm:$0xff] }
 0x293   : > { %2717 = vmatprep.subr.mxu1 %v2432_v41 }
 0x294   : > { %3035 = vpow2.f32 %v1255_v42  ;;  %2718 = vmatpush3.msra.mxu1 %v2432_v41  ;;  %v2425_v41 = vld [vmem:[%s3762_s16 + $0xb0] sm:$0xff] }
 0x295   : > { %v2647_v18 = vpop.f32.mrf.mxu1  ;;  %2719 = vmatprep.subr.mxu1 %v2431_v53 }
 0x296   : > { %v1059_v19 = vadd.f32 %v2647_v18, %v4103_v49  ;;  %2720 = vmatpush3.msra.mxu1 %v2431_v53  ;;  %v4225_v53 = vld [vmem:[%s3760_s28 + $0x2] sm:$0x3] }
 0x297   : > { %v1053_v20 = vpop.f32.mrf.mxu1  ;;  %v3030_v56 = vpop.eup %3029 }
 0x298   : > { %v1054_v21 = vadd.f32 %v4103_v49, %v1053_v20  ;;  %1325 = vadd.xlane.f32.xlu1 %v1059_v19  ;;  %v1261_v45 = vmul.f32 1.442695, %v1059_v19  ;;  %v1280_v17 = vmul.f32 %v3030_v56, %v649_v3 }
 0x299   : > { %v3032_v11 = vpop.eup %3031 }
 0x29a   : > { %1323 = vadd.xlane.f32.xlu0 %v1054_v21  ;;  %v1259_v57 = vmul.f32 1.442695, %v1054_v21  ;;  %3037 = vpow2.f32 %v1261_v45  ;;  %v1279_v23 = vmul.f32 %v3032_v11, %v647_v15  ;;  %v657_v45 = vld [vmem:[%s3789_s14 + $0x98] sm:$0xff] }
 0x29c   : > { %3039 = vpow2.f32 %v1259_v57 }
 0x29d   : > { %v2650_v22 = vpop.f32.mrf.mxu1 }
 0x29e   : > { %v1069_v24 = vadd.f32 %v2650_v22, %v4103_v49 }
 0x29f   : > { %v1063_v26 = vpop.f32.mrf.mxu1  ;;  %v3034_v21 = vpop.eup %3033 }
 0x2a0   : > { %v1064_v27 = vadd.f32 %v4103_v49, %v1063_v26  ;;  %1329 = vadd.xlane.f32.xlu1 %v1069_v24  ;;  %v1265_v63 = vmul.f32 1.442695, %v1069_v24  ;;  %v653_v24 = vld [vmem:[%s3789_s14 + $0x78] sm:$0xff] }
 0x2a1   : > { %v3036_v30 = vpop.eup %3035 }
 0x2a2   : > { %1327 = vadd.xlane.f32.xlu0 %v1064_v27  ;;  %v1263_v40 = vmul.f32 1.442695, %v1064_v27  ;;  %3041 = vpow2.f32 %v1265_v63  ;;  %v2430_v63 = vld [vmem:[%s3762_s16 + $0xd8] sm:$0xff] }
 0x2a3   : > { %2721 = vmatprep.subr.mxu1 %v2430_v63 }
 0x2a4   : > { %3043 = vpow2.f32 %v1263_v40  ;;  %v2429_v40 = vld [vmem:[%s3762_s16 + $0xd0] sm:$0xff]  ;;  %2722 = vmatpush3.msra.mxu1 %v2430_v63 }
 0x2a5   : > { %v2653_v31 = vpop.f32.mrf.mxu1  ;;  %2723 = vmatprep.subr.mxu1 %v2429_v40 }
 0x2a6   : > { %v1079_v32 = vadd.f32 %v2653_v31, %v4103_v49  ;;  %2724 = vmatpush3.msra.mxu1 %v2429_v40 }
 0x2a7   : > { %v1073_v34 = vpop.f32.mrf.mxu1  ;;  %v3038_v42 = vpop.eup %3037 }
 0x2a8   : > { %v1074_v35 = vadd.f32 %v4103_v49, %v1073_v34  ;;  %1333 = vadd.xlane.f32.xlu1 %v1079_v32  ;;  %v1269_v7 = vmul.f32 1.442695, %v1079_v32  ;;  %v651_v32 = vld [vmem:[%s3789_s14 + $0x68] sm:$0xff]  ;;  %v1284_v62 = vmul.f32 %v3038_v42, %v657_v45  ;;  %v2421_v45 = vld [vmem:[%s3762_s16 + $0x90] sm:$0xff] }
 0x2a9   : > { %v3040_v55 = vpop.eup %3039  ;;  %v2424_v42 = vld [vmem:[%s3762_s16 + $0xa8] sm:$0xff] }
 0x2aa   : > { %1331 = vadd.xlane.f32.xlu0 %v1074_v35  ;;  %v1267_v12 = vmul.f32 1.442695, %v1074_v35  ;;  %3045 = vpow2.f32 %v1269_v7  ;;  %v1282_v35 = vmul.f32 %v3034_v21, %v653_v24 }
 0x2ac   : > { %3047 = vpow2.f32 %v1267_v12 }
 0x2ad   : > { %v2656_v44 = vpop.f32.mrf.mxu1 }
 0x2ae   : > { %v1089_v47 = vadd.f32 %v2656_v44, %v4103_v49 }
 0x2af   : > { %v1083_v51 = vpop.f32.mrf.mxu1 }
 0x2b0   : > { %v1084_v58 = vadd.f32 %v4103_v49, %v1083_v51  ;;  %1337 = vadd.xlane.f32.xlu1 %v1089_v47  ;;  %v643_v49 = vld [vmem:[%s3789_s14 + $0x28] sm:$0xff]  ;;  %v1273_v18 = vmul.f32 1.442695, %v1089_v47  ;;  %v1281_v51 = vmul.f32 %v3036_v30, %v651_v32 }
 0x2b1   : > { %v2691_v60 = vpop.f32.mrf.mxu1  ;;  %v1277_v9 = vmul.f32 %v3028_v5, %v643_v49  ;;  %v659_v49 = vld [vmem:[%s3789_s14 + $0xa8] sm:$0xff] }
 0x2b2   : > { %v1170_v0 = vadd.f32 %v2691_v60, %v4122_v54  ;;  %1335 = vadd.xlane.f32.xlu0 %v1084_v58  ;;  %v1271_v25 = vmul.f32 1.442695, %v1084_v58  ;;  %3049 = vpow2.f32 %v1273_v18  ;;  %v655_v58 = vld [vmem:[%s3789_s14 + $0x88] sm:$0xff] }
 0x2b3   : > { %v1164_v2 = vpop.f32.mrf.mxu1  ;;  %v1283_v5 = vmul.f32 %v3040_v55, %v655_v58  ;;  %v4230_v55 = vrot.slane %v4225_v53, %v740_v38 }
 0x2b4   : > { %v1292_v43 = vadd.f32 %v1276_v1, %v1170_v0  ;;  %v1165_v46 = vadd.f32 %v4122_v54, %v1164_v2  ;;  %3051 = vpow2.f32 %v1271_v25  ;;  %v3042_v0 = vpop.eup %3041  ;;  %v667_v25 = vld [vmem:[%s3789_s14 + $0xe8] sm:$0xff] }
 0x2b5   : > { %v2694_v52 = vpop.f32.mrf.mxu1  ;;  %v1286_v56 = vmul.f32 %v3042_v0, %v661_v39 }
 0x2b6   : > { %2031 = vst [vmem:[%s3789_s14 + $0x18] sm:$0xff] %v1292_v43  ;;  %v1291_v61 = vadd.f32 %v1275_v4, %v1165_v46  ;;  %v1180_v8 = vadd.f32 %v2694_v52, %v4122_v54 }
 0x2b7   : > { %v1174_v10 = vpop.f32.mrf.mxu1 }
 0x2b8   : > { %2030 = vst [vmem:[%s3789_s14 + $0x8] sm:$0xff] %v1291_v61  ;;  %v4134_v13 = vadd.f32 %v1278_v6, %v1180_v8  ;;  %v1175_v14 = vadd.f32 %v4122_v54, %v1174_v10  ;;  %1488 = vmatmul.mubr.f32.vlgmr.msra.gmra.mxu0 %v1291_v61  ;;  %v665_v8 = vld [vmem:[%s3789_s14 + $0xd8] sm:$0xff] }
 0x2b9   : > { %v2697_v16 = vpop.f32.mrf.mxu1  ;;  %1493 = vmatprep.mubr.f32.mxu0 %v3447_v37 }
 0x2ba   : > { %2033 = vst [vmem:[%s3789_s14 + $0x38] sm:$0xff] %v4134_v13  ;;  %v1293_v19 = vadd.f32 %v1277_v9, %v1175_v14  ;;  %v1190_v20 = vadd.f32 %v2697_v16, %v4122_v54 }
 0x2bb   : > { %v1184_v22 = vpop.f32.mrf.mxu1 }
 0x2bc   : > { %2032 = vst [vmem:[%s3789_s14 + $0x28] sm:$0xff] %v1293_v19  ;;  %v4144_v26 = vadd.f32 %v1280_v17, %v1190_v20  ;;  %v1185_v27 = vadd.f32 %v4122_v54, %v1184_v22  ;;  %1494 = vmatmul.mubr.f32.gmra.mxu0 %v1292_v43  ;;  %v3044_v43 = vpop.eup %3043 }
 0x2bd   : > { %v2700_v31 = vpop.f32.mrf.mxu1  ;;  %1499 = vmatprep.mubr.f32.mxu0 %v3447_v37  ;;  %v3046_v7 = vpop.eup %3045  ;;  %v1285_v9 = vmul.f32 %v3044_v43, %v659_v49 }
 0x2be   : > { %2035 = vst [vmem:[%s3789_s14 + $0x58] sm:$0xff] %v4144_v26  ;;  %v1295_v33 = vadd.f32 %v1279_v23, %v1185_v27  ;;  %v1200_v34 = vadd.f32 %v2700_v31, %v4122_v54  ;;  %v3048_v11 = vpop.eup %3047  ;;  %v1288_v16 = vmul.f32 %v3046_v7, %v665_v8 }
 0x2bf   : > { %v1194_v44 = vpop.f32.mrf.mxu1  ;;  %v3050_v17 = vpop.eup %3049 }
 0x2c0   : > { %2034 = vst [vmem:[%s3789_s14 + $0x48] sm:$0xff] %v1295_v33  ;;  %v4157_v47 = vadd.f32 %v1282_v35, %v1200_v34  ;;  %v1195_v50 = vadd.f32 %v4122_v54, %v1194_v44  ;;  %1500 = vmatmul.mubr.f32.gmra.mxu0 %v1293_v19  ;;  %v669_v19 = vld [vmem:[%s3789_s14 + $0xf8] sm:$0xff]  ;;  %v2427_v34 = vld [vmem:[%s3762_s16 + $0xc0] sm:$0xff] }
 0x2c1   : > { %v2703_v57 = vpop.f32.mrf.mxu1  ;;  %1505 = vmatprep.mubr.f32.mxu0 %v3447_v37  ;;  %v3052_v23 = vpop.eup %3051  ;;  %v1290_v29 = vmul.f32 %v3050_v17, %v669_v19  ;;  %v2426_v35 = vld [vmem:[%s3762_s16 + $0xb8] sm:$0xff] }
 0x2c2   : > { %2037 = vst [vmem:[%s3789_s14 + $0x78] sm:$0xff] %v4157_v47  ;;  %v4165_v59 = vadd.f32 %v1281_v51, %v1195_v50  ;;  %v1210_v60 = vadd.f32 %v2703_v57, %v4122_v54  ;;  %v2422_v44 = vld [vmem:[%s3762_s16 + $0x98] sm:$0xff]  ;;  %v2419_v50 = vld [vmem:[%s3762_s16 + $0x80] sm:$0xff] }
 0x2c3   : > { %v1204_v1 = vpop.f32.mrf.mxu1  ;;  %v2451_v51 = vld [vmem:[%s3785_s17 + $0xf8] sm:$0xff] }
 0x2c4   : > { %2036 = vst [vmem:[%s3789_s14 + $0x68] sm:$0xff] %v4165_v59  ;;  %v4172_v2 = vadd.f32 %v1284_v62, %v1210_v60  ;;  %v1205_v4 = vadd.f32 %v4122_v54, %v1204_v1  ;;  %1506 = vmatmul.mubr.f32.gmra.mxu0 %v4134_v13  ;;  %v663_v13 = vld [vmem:[%s3789_s14 + $0xc8] sm:$0xff] }
 0x2c5   : > { %v2706_v46 = vpop.f32.mrf.mxu1  ;;  %1511 = vmatprep.mubr.f32.mxu0 %v3447_v37  ;;  %v1287_v22 = vmul.f32 %v3048_v11, %v663_v13 }
 0x2c6   : > { %2039 = vst [vmem:[%s3789_s14 + $0x98] sm:$0xff] %v4172_v2  ;;  %v1299_v52 = vadd.f32 %v1283_v5, %v1205_v4  ;;  %v1220_v6 = vadd.f32 %v2706_v46, %v4122_v54 }
 0x2c7   : > { %v1214_v61 = vpop.f32.mrf.mxu1 }
 0x2c8   : > { %2038 = vst [vmem:[%s3789_s14 + $0x88] sm:$0xff] %v1299_v52  ;;  %v1302_v3 = vadd.f32 %v1286_v56, %v1220_v6  ;;  %v1215_v10 = vadd.f32 %v4122_v54, %v1214_v61  ;;  %1512 = vmatmul.mubr.f32.gmra.mxu0 %v1295_v33  ;;  %v1289_v33 = vmul.f32 %v3052_v23, %v667_v25  ;;  %v2450_v6 = vld [vmem:[%s3785_s17 + $0xf0] sm:$0xff]  ;;  %v2449_v61 = vld [vmem:[%s3785_s17 + $0xe8] sm:$0xff] }
 0x2c9   : > { %v2709_v12 = vpop.f32.mrf.mxu1  ;;  %1517 = vmatprep.mubr.f32.mxu0 %v3447_v37 }
 0x2ca   : > { %2041 = vst [vmem:[%s3789_s14 + $0xb8] sm:$0xff] %v1302_v3  ;;  %v1301_v14 = vadd.f32 %v1285_v9, %v1215_v10  ;;  %v1230_v15 = vadd.f32 %v2709_v12, %v4122_v54  ;;  %v2448_v10 = vld [vmem:[%s3785_s17 + $0xe0] sm:$0xff]  ;;  %v2447_v12 = vld [vmem:[%s3785_s17 + $0xd8] sm:$0xff] }
 0x2cb   : > { %v1224_v18 = vpop.f32.mrf.mxu1 }
 0x2cc   : > { %2040 = vst [vmem:[%s3789_s14 + $0xa8] sm:$0xff] %v1301_v14  ;;  %v1304_v20 = vadd.f32 %v1288_v16, %v1230_v15  ;;  %v1225_v21 = vadd.f32 %v4122_v54, %v1224_v18  ;;  %1518 = vmatmul.mubr.f32.gmra.mxu0 %v4144_v26  ;;  %v2446_v15 = vld [vmem:[%s3785_s17 + $0xd0] sm:$0xff]  ;;  %v2445_v18 = vld [vmem:[%s3785_s17 + $0xc8] sm:$0xff] }
 0x2cd   : > { %v2712_v24 = vpop.f32.mrf.mxu1  ;;  %1523 = vmatprep.mubr.f32.mxu0 %v3447_v37 }
 0x2ce   : > { %2043 = vst [vmem:[%s3789_s14 + $0xd8] sm:$0xff] %v1304_v20  ;;  %v1303_v27 = vadd.f32 %v1287_v22, %v1225_v21  ;;  %v1240_v28 = vadd.f32 %v2712_v24, %v4122_v54  ;;  %v2444_v21 = vld [vmem:[%s3785_s17 + $0xc0] sm:$0xff]  ;;  %v2443_v24 = vld [vmem:[%s3785_s17 + $0xb8] sm:$0xff] }
 0x2cf   : > { %v1234_v30 = vpop.f32.mrf.mxu1 }
 0x2d0   : > { %2042 = vst [vmem:[%s3789_s14 + $0xc8] sm:$0xff] %v1303_v27  ;;  %v1306_v31 = vadd.f32 %v1290_v29, %v1240_v28  ;;  %v1235_v32 = vadd.f32 %v4122_v54, %v1234_v30  ;;  %1524 = vmatmul.mubr.f32.gmra.mxu0 %v4165_v59  ;;  %v2428_v54 = vld [vmem:[%s3762_s16 + $0xc8] sm:$0xff]  ;;  %v2442_v28 = vld [vmem:[%s3785_s17 + $0xb0] sm:$0xff] }
 0x2d1   : > { %1529 = vmatprep.mubr.f32.mxu0 %v3447_v37  ;;  %2725 = vmatprep.subr.mxu1 %v2428_v54 }
 0x2d2   : > { %2045 = vst [vmem:[%s3789_s14 + $0xf8] sm:$0xff] %v1306_v31  ;;  %v1305_v26 = vadd.f32 %v1289_v33, %v1235_v32  ;;  %2726 = vmatpush3.msra.mxu1 %v2428_v54 }
 0x2d3   : > { %2727 = vmatprep.subr.mxu1 %v2427_v34 }
 0x2d4   : > { %2044 = vst [vmem:[%s3789_s14 + $0xe8] sm:$0xff] %v1305_v26  ;;  %1530 = vmatmul.mubr.f32.gmra.mxu0 %v4157_v47  ;;  %2728 = vmatpush3.msra.mxu1 %v2427_v34  ;;  %v2420_v47 = vld [vmem:[%s3762_s16 + $0x88] sm:$0xff] }
 0x2d5   : > { %1535 = vmatprep.mubr.f32.mxu0 %v3447_v37  ;;  %2729 = vmatprep.subr.mxu1 %v2426_v35 }
 0x2d6   : > { %2730 = vmatpush3.msra.mxu1 %v2426_v35  ;;  %v2439_v35 = vld [vmem:[%s3785_s17 + $0x98] sm:$0xff] }
 0x2d7   : > { %2731 = vmatprep.subr.mxu1 %v2425_v41 }
 0x2d8   : > { %1536 = vmatmul.mubr.f32.gmra.mxu0 %v1299_v52  ;;  %2732 = vmatpush3.msra.mxu1 %v2425_v41 }
 0x2d9   : > { %1541 = vmatprep.mubr.f32.mxu0 %v3447_v37  ;;  %2733 = vmatprep.subr.mxu1 %v2424_v42 }
 0x2da   : > { %2734 = vmatpush3.msra.mxu1 %v2424_v42 }
 0x2dc   : > { %1542 = vmatmul.mubr.f32.gmra.mxu0 %v4172_v2 }
 0x2dd   : > { %1547 = vmatprep.mubr.f32.mxu0 %v3447_v37 }
 0x2e0   : > { %1548 = vmatmul.mubr.f32.gmra.mxu0 %v1301_v14 }
 0x2e1   : > { %1553 = vmatprep.mubr.f32.mxu0 %v3447_v37 }
 0x2e4   : > { %1554 = vmatmul.mubr.f32.gmra.mxu0 %v1302_v3 }
 0x2e5   : > { %1559 = vmatprep.mubr.f32.mxu0 %v3447_v37 }
 0x2e8   : > { %1560 = vmatmul.mubr.f32.gmra.mxu0 %v1303_v27 }
 0x2e9   : > { %1565 = vmatprep.mubr.f32.mxu0 %v3447_v37 }
 0x2ec   : > { %1566 = vmatmul.mubr.f32.gmra.mxu0 %v1304_v20 }
 0x2ed   : > { %1571 = vmatprep.mubr.f32.mxu0 %v3447_v37 }
 0x2f0   : > { %1572 = vmatmul.mubr.f32.gmra.mxu0 %v1305_v26  ;;  %v2440_v26 = vld [vmem:[%s3785_s17 + $0xa0] sm:$0xff] }
 0x2f1   : > { %1577 = vmatprep.mubr.f32.mxu0 %v3447_v37  ;;  %v2423_v37 = vld [vmem:[%s3762_s16 + $0xa0] sm:$0xff] }
 0x2f2   : > { %2735 = vmatprep.subr.mxu1 %v2423_v37 }
 0x2f3   : > { %2736 = vmatpush3.msra.mxu1 %v2423_v37  ;;  %v2438_v37 = vld [vmem:[%s3785_s17 + $0x90] sm:$0xff] }
 0x2f4   : > { %1578 = vmatmul.mubr.f32.gmra.mxu0 %v1306_v31  ;;  %2737 = vmatprep.subr.mxu1 %v2422_v44  ;;  %v2441_v31 = vld [vmem:[%s3785_s17 + $0xa8] sm:$0xff] }
 0x2f5   : > { %2738 = vmatpush3.msra.mxu1 %v2422_v44 }
 0x2f6   : > { %2739 = vmatprep.subr.mxu1 %v2421_v45 }
 0x2f7   : > { %2740 = vmatpush3.msra.mxu1 %v2421_v45 }
 0x2f8   : > { %2741 = vmatprep.subr.mxu1 %v2420_v47 }
 0x2f9   : > { %2742 = vmatpush3.msra.mxu1 %v2420_v47  ;;  %v2437_v47 = vld [vmem:[%s3785_s17 + $0x88] sm:$0xff] }
 0x2fa   : > { %2743 = vmatprep.subr.mxu1 %v2419_v50 }
 0x2fb   : > { %2744 = vmatpush3.msra.mxu1 %v2419_v50 }
 0x2fc   : > { %2769 = vmatprep.subr.mxu1 %v2451_v51 }
 0x378   : > { %v1489_v57 = vpop.f32.mrf.mxu0 }
 0x379   : > { %v1490_v58 = vadd.f32 %v1489_v57, %v4230_v55  ;;  %v2436_v57 = vld [vmem:[%s3785_s17 + $0x80] sm:$0xff] }
 0x37a   : > { %v4233_v59 = vpop.f32.mrf.mxu0 }
 0x37b   : > { %3053 = vtanh.f32 %v1490_v58 }
 0x37c   : > { %v1495_v60 = vpop.f32.mrf.mxu0 }
 0x37d   : > { %v1496_v62 = vadd.f32 %v1495_v60, %v4230_v55 }
 0x37e   : > { %v4236_v63 = vpop.f32.mrf.mxu0 }
 0x37f   : > { %3055 = vtanh.f32 %v1496_v62 }
 0x380   : > { %v1501_v0 = vpop.f32.mrf.mxu0 }
 0x381   : > { %v1502_v1 = vadd.f32 %v1501_v0, %v4230_v55 }
 0x382   : > { %v4239_v39 = vpop.f32.mrf.mxu0 }
 0x383   : > { %3057 = vtanh.f32 %v1502_v1 }
 0x384   : > { %v1507_v38 = vpop.f32.mrf.mxu0 }
 0x385   : > { %v1508_v2 = vadd.f32 %v1507_v38, %v4230_v55 }
 0x386   : > { %v4242_v4 = vpop.f32.mrf.mxu0 }
 0x387   : > { %3059 = vtanh.f32 %v1508_v2 }
 0x388   : > { %v3054_v5 = vpop.eup %3053  ;;  %v1513_v40 = vpop.f32.mrf.mxu0 }
 0x389   : > { %v1514_v43 = vadd.f32 %v1513_v40, %v4230_v55  ;;  %2745 = vmatprep.mubr.f32.mxu1 %v3054_v5  ;;  %v4288_v5 = vrot.slane %v4225_v53, %v744_v48 }
 0x38a   : > { %v4245_v46 = vpop.f32.mrf.mxu0 }
 0x38b   : > { %3061 = vtanh.f32 %v1514_v43  ;;  %v1498_v36 = vadd.f32 %v4236_v63, %v4288_v5  ;;  %v1504_v53 = vadd.f32 %v4239_v39, %v4288_v5 }
 0x38c   : > { %v3056_v49 = vpop.eup %3055  ;;  %v1519_v52 = vpop.f32.mrf.mxu0 }
 0x38d   : > { %v1520_v56 = vadd.f32 %v1519_v52, %v4230_v55  ;;  %2746 = vmatmul.mubr.f32.vlgmr.msra.gmra.mxu1 %v3056_v49 }
 0x38e   : > { %v4249_v7 = vpop.f32.mrf.mxu0  ;;  %2770 = vmatpush3.msra.mxu1 %v2451_v51 }
 0x38f   : > { %3063 = vtanh.f32 %v1520_v56  ;;  %2771 = vmatprep.subr.mxu1 %v2450_v6 }
 0x390   : > { %v3058_v8 = vpop.eup %3057  ;;  %v1525_v3 = vpop.f32.mrf.mxu0  ;;  %2772 = vmatpush3.msra.mxu1 %v2450_v6  ;;  %v1492_v6 = vadd.f32 %v4233_v59, %v4288_v5  ;;  %v1522_v59 = vadd.f32 %v4249_v7, %v4288_v5 }
 0x391   : > { %v1526_v9 = vadd.f32 %v1525_v3, %v4230_v55  ;;  %2748 = vmatprep.mubr.f32.mxu1 %v3058_v8  ;;  %2773 = vmatprep.subr.mxu1 %v2449_v61  ;;  %v1510_v8 = vadd.f32 %v4242_v4, %v4288_v5 }
 0x392   : > { %v4254_v11 = vpop.f32.mrf.mxu0  ;;  %2774 = vmatpush3.msra.mxu1 %v2449_v61 }
 0x393   : > { %3065 = vtanh.f32 %v1526_v9  ;;  %2775 = vmatprep.subr.mxu1 %v2448_v10  ;;  %v1528_v39 = vadd.f32 %v4254_v11, %v4288_v5 }
 0x394   : > { %v3060_v13 = vpop.eup %3059  ;;  %v1531_v14 = vpop.f32.mrf.mxu0  ;;  %2776 = vmatpush3.msra.mxu1 %v2448_v10 }
 0x395   : > { %v1532_v16 = vadd.f32 %v1531_v14, %v4230_v55  ;;  %2749 = vmatmul.mubr.f32.gmra.mxu1 %v3060_v13  ;;  %2777 = vmatprep.subr.mxu1 %v2447_v12 }
 0x396   : > { %v4259_v17 = vpop.f32.mrf.mxu0  ;;  %2778 = vmatpush3.msra.mxu1 %v2447_v12 }
 0x397   : > { %3067 = vtanh.f32 %v1532_v16  ;;  %2779 = vmatprep.subr.mxu1 %v2446_v15  ;;  %v1534_v4 = vadd.f32 %v4259_v17, %v4288_v5 }
 0x398   : > { %v3062_v19 = vpop.eup %3061  ;;  %v1537_v20 = vpop.f32.mrf.mxu0  ;;  %2780 = vmatpush3.msra.mxu1 %v2446_v15 }
 0x399   : > { %v1538_v22 = vadd.f32 %v1537_v20, %v4230_v55  ;;  %2751 = vmatprep.mubr.f32.mxu1 %v3062_v19  ;;  %2781 = vmatprep.subr.mxu1 %v2445_v18 }
 0x39a   : > { %v4264_v23 = vpop.f32.mrf.mxu0  ;;  %2782 = vmatpush3.msra.mxu1 %v2445_v18 }
 0x39b   : > { %3069 = vtanh.f32 %v1538_v22  ;;  %2783 = vmatprep.subr.mxu1 %v2444_v21 }
 0x39c   : > { %v3064_v25 = vpop.eup %3063  ;;  %v1543_v27 = vpop.f32.mrf.mxu0  ;;  %2784 = vmatpush3.msra.mxu1 %v2444_v21 }
 0x39d   : > { %v1544_v29 = vadd.f32 %v1543_v27, %v4230_v55  ;;  %2752 = vmatmul.mubr.f32.gmra.mxu1 %v3064_v25  ;;  %2785 = vmatprep.subr.mxu1 %v2443_v24 }
 0x39e   : > { %v4269_v30 = vpop.f32.mrf.mxu0  ;;  %2786 = vmatpush3.msra.mxu1 %v2443_v24 }
 0x39f   : > { %3071 = vtanh.f32 %v1544_v29  ;;  %2787 = vmatprep.subr.mxu1 %v2442_v28  ;;  %v1546_v7 = vadd.f32 %v4269_v30, %v4288_v5 }
 0x3a0   : > { %v3066_v32 = vpop.eup %3065  ;;  %v1549_v33 = vpop.f32.mrf.mxu0  ;;  %2788 = vmatpush3.msra.mxu1 %v2442_v28 }
 0x3a1   : > { %v1550_v54 = vadd.f32 %v1549_v33, %v4230_v55  ;;  %2754 = vmatprep.mubr.f32.mxu1 %v3066_v32  ;;  %2789 = vmatprep.subr.mxu1 %v2441_v31 }
 0x3a2   : > { %v4274_v34 = vpop.f32.mrf.mxu0  ;;  %2790 = vmatpush3.msra.mxu1 %v2441_v31 }
 0x3a3   : > { %3073 = vtanh.f32 %v1550_v54  ;;  %2791 = vmatprep.subr.mxu1 %v2440_v26  ;;  %v1552_v11 = vadd.f32 %v4274_v34, %v4288_v5 }
 0x3a4   : > { %v3068_v41 = vpop.eup %3067  ;;  %v1555_v42 = vpop.f32.mrf.mxu0  ;;  %2792 = vmatpush3.msra.mxu1 %v2440_v26  ;;  %v4321_v26 = vld [vmem:[%s3773_s8 + $0x1] ss:$0 sm:$0xff]  ;;  %s3311_s8 = scalar_lea.vmem %s3310_s22, 8192 }
 0x3a5   : > { %v1556_v44 = vadd.f32 %v1555_v42, %v4230_v55  ;;  %2755 = vmatmul.mubr.f32.gmra.mxu1 %v3068_v41  ;;  %2793 = vmatprep.subr.mxu1 %v2439_v35  ;;  %p3313_p10 = scmp.lt.s32.totalorder %s3311_s8, %s3305_s21 }
 0x3a6   : > { %v4279_v45 = vpop.f32.mrf.mxu0  ;;  %2794 = vmatpush3.msra.mxu1 %v2439_v35 }
 0x3a7   : > { %3075 = vtanh.f32 %v1556_v44  ;;  %2795 = vmatprep.subr.mxu1 %v2438_v37  ;;  %v1558_v14 = vadd.f32 %v4279_v45, %v4288_v5  ;;  %p3314_p9 = por %p3313_p10, %p3312_p5 }
 0x3a8   : > { %v3070_v50 = vpop.eup %3069  ;;  %v1561_v51 = vpop.f32.mrf.mxu0  ;;  %2796 = vmatpush3.msra.mxu1 %v2438_v37 }
 0x3a9   : > { %v1562_v58 = vadd.f32 %v1561_v51, %v4230_v55  ;;  %2757 = vmatprep.mubr.f32.mxu1 %v3070_v50  ;;  %2797 = vmatprep.subr.mxu1 %v2437_v47  ;;  %p3315_p13 = pnand %p3314_p9, %p3308_p3 }
 0x3aa   : > { %v1563_v60 = vpop.f32.mrf.mxu0  ;;  %2798 = vmatpush3.msra.mxu1 %v2437_v47 }
 0x3ab   : > { %3077 = vtanh.f32 %v1562_v58  ;;  %2799 = vmatprep.subr.mxu1 %v2436_v57  ;;  %v1564_v16 = vadd.f32 %v1563_v60, %v4288_v5 }
 0x3ac   : > { %v3072_v62 = vpop.eup %3071  ;;  %v1567_v0 = vpop.f32.mrf.mxu0  ;;  %2800 = vmatpush3.msra.mxu1 %v2436_v57 }
 0x3ad   : > { %v1568_v1 = vadd.f32 %v1567_v0, %v4230_v55  ;;  %2758 = vmatmul.mubr.f32.gmra.mxu1 %v3072_v62 }
 0x3ae   : > { %v1569_v38 = vpop.f32.mrf.mxu0 }
 0x3af   : > { %3079 = vtanh.f32 %v1568_v1  ;;  %v1570_v18 = vadd.f32 %v1569_v38, %v4288_v5 }
 0x3b0   : > { %v3074_v2 = vpop.eup %3073  ;;  %v1573_v40 = vpop.f32.mrf.mxu0 }
 0x3b1   : > { %v1574_v43 = vadd.f32 %v1573_v40, %v4230_v55  ;;  %2760 = vmatprep.mubr.f32.mxu1 %v3074_v2 }
 0x3b2   : > { %v1575_v49 = vpop.f32.mrf.mxu0 }
 0x3b3   : > { %3081 = vtanh.f32 %v1574_v43  ;;  %v1576_v20 = vadd.f32 %v1575_v49, %v4288_v5 }
 0x3b4   : > { %v3076_v52 = vpop.eup %3075  ;;  %v1579_v56 = vpop.f32.mrf.mxu0 }
 0x3b5   : > { %v1580_v61 = vadd.f32 %v1579_v56, %v4230_v55  ;;  %2761 = vmatmul.mubr.f32.gmra.mxu1 %v3076_v52  ;;  %v1516_v55 = vadd.f32 %v4245_v46, %v4288_v5  ;;  %v1540_v46 = vadd.f32 %v4264_v23, %v4288_v5 }
 0x3b6   : > { %v1581_v21 = vpop.f32.mrf.mxu0 }
 0x3b7   : > { %3083 = vtanh.f32 %v1580_v61  ;;  %v1582_v23 = vadd.f32 %v1581_v21, %v4288_v5 }
 0x3b8   : > { %v3078_v48 = vpop.eup %3077  ;;  %3085 = vtanh.f32 %v1492_v6 }
 0x3b9   : > { %2763 = vmatprep.mubr.f32.mxu1 %v3078_v48  ;;  %3087 = vtanh.f32 %v1498_v36 }
 0x3ba   : > { %3089 = vtanh.f32 %v1504_v53 }
 0x3bb   : > { %3091 = vtanh.f32 %v1510_v8 }
 0x3bc   : > { %v3080_v3 = vpop.eup %3079  ;;  %3093 = vtanh.f32 %v1516_v55 }
 0x3bd   : > { %2764 = vmatmul.mubr.f32.gmra.mxu1 %v3080_v3  ;;  %3095 = vtanh.f32 %v1522_v59 }
 0x3be   : > { %3097 = vtanh.f32 %v1528_v39 }
 0x3bf   : > { %3099 = vtanh.f32 %v1534_v4 }
 0x3c0   : > { %v3082_v63 = vpop.eup %3081  ;;  %3101 = vtanh.f32 %v1540_v46 }
 0x3c1   : > { %2766 = vmatprep.mubr.f32.mxu1 %v3082_v63  ;;  %3103 = vtanh.f32 %v1546_v7 }
 0x3c2   : > { %3105 = vtanh.f32 %v1552_v11 }
 0x3c3   : > { %3107 = vtanh.f32 %v1558_v14 }
 0x3c4   : > { %v3084_v10 = vpop.eup %3083  ;;  %3109 = vtanh.f32 %v1564_v16 }
 0x3c5   : > { %v3086_v9 = vpop.eup %3085  ;;  %2767 = vmatmul.mubr.f32.gmra.mxu1 %v3084_v10  ;;  %3111 = vtanh.f32 %v1570_v18 }
 0x3c6   : > { %2801 = vmatprep.mubr.f32.mxu1 %v3086_v9  ;;  %v3088_v12 = vpop.eup %3087  ;;  %3113 = vtanh.f32 %v1576_v20 }
 0x3c7   : > { %v3090_v13 = vpop.eup %3089  ;;  %3115 = vtanh.f32 %v1582_v23 }
 0x3c8   : > { %v3092_v15 = vpop.eup %3091 }
 0x3c9   : > { %2802 = vmatmul.mubr.f32.vlgmr.msra.gmra.mxu1 %v3088_v12  ;;  %v3094_v17 = vpop.eup %3093  ;;  %v4339_v12 = vld [vmem:[%s3778_s19 + $0x1] ss:$0 sm:$0xff] }
 0x3ca   : > { %2804 = vmatprep.mubr.f32.mxu1 %v3090_v13  ;;  %v3096_v19 = vpop.eup %3095 }
 0x3cb   : > { %v3098_v22 = vpop.eup %3097 }
 0x3cc   : > { %v3100_v24 = vpop.eup %3099 }
 0x3cd   : > { %2805 = vmatmul.mubr.f32.gmra.mxu1 %v3092_v15  ;;  %v3102_v25 = vpop.eup %3101 }
 0x3ce   : > { %2807 = vmatprep.mubr.f32.mxu1 %v3094_v17  ;;  %v3104_v27 = vpop.eup %3103 }
 0x3cf   : > { %v3106_v28 = vpop.eup %3105 }
 0x3d0   : > { %v3108_v29 = vpop.eup %3107 }
 0x3d1   : > { %2808 = vmatmul.mubr.f32.gmra.mxu1 %v3096_v19  ;;  %v3110_v30 = vpop.eup %3109  ;;  %v3149_v19 = vld [vmem:[%s3789_s14 + $0x10] sm:$0xff] }
 0x3d2   : > { %2810 = vmatprep.mubr.f32.mxu1 %v3098_v22  ;;  %v3112_v31 = vpop.eup %3111  ;;  %v3150_v22 = vld [vmem:[%s3789_s14] sm:$0xff] }
 0x3d3   : > { %v3114_v32 = vpop.eup %3113 }
 0x3d4   : > { %v3116_v33 = vpop.eup %3115 }
 0x3d5   : > { %2811 = vmatmul.mubr.f32.gmra.mxu1 %v3100_v24 }
 0x3d6   : > { %2813 = vmatprep.mubr.f32.mxu1 %v3102_v25 }
 0x3d9   : > { %2814 = vmatmul.mubr.f32.gmra.mxu1 %v3104_v27 }
 0x3da   : > { %2816 = vmatprep.mubr.f32.mxu1 %v3106_v28 }
 0x3dd   : > { %2817 = vmatmul.mubr.f32.gmra.mxu1 %v3108_v29 }
 0x3de   : > { %2819 = vmatprep.mubr.f32.mxu1 %v3110_v30  ;;  %v3151_v30 = vld [vmem:[%s3789_s14 + $0x30] sm:$0xff] }
 0x3e1   : > { %2820 = vmatmul.mubr.f32.gmra.mxu1 %v3112_v31 }
 0x3e2   : > { %2822 = vmatprep.mubr.f32.mxu1 %v3114_v32 }
 0x3e5   : > { %2823 = vmatmul.mubr.f32.gmra.mxu1 %v3116_v33 }
 0x44d   : > { %v2747_v54 = vpop.f32.mrf.mxu1 }
 0x44e   : > { %v1694_v34 = vadd.f32 %v2747_v54, %v4321_v26 }
 0x44f   : > { %v1688_v35 = vpop.f32.mrf.mxu1 }
 0x450   : > { %v1689_v41 = vadd.f32 %v4321_v26, %v1688_v35  ;;  %1984 = vadd.xlane.f32.xlu1 %v1694_v34  ;;  %v1920_v43 = vmul.f32 1.442695, %v1694_v34  ;;  %v3152_v35 = vld [vmem:[%s3789_s14 + $0x20] sm:$0xff] }
 0x452   : > { %1982 = vadd.xlane.f32.xlu0 %v1689_v41  ;;  %v1918_v52 = vmul.f32 1.442695, %v1689_v41  ;;  %3117 = vpow2.f32 %v1920_v43 }
 0x454   : > { %3119 = vpow2.f32 %v1918_v52 }
 0x455   : > { %v2750_v42 = vpop.f32.mrf.mxu1 }
 0x456   : > { %v1704_v37 = vadd.f32 %v2750_v42, %v4321_v26 }
 0x457   : > { %v1698_v44 = vpop.f32.mrf.mxu1 }
 0x458   : > { %v1699_v45 = vadd.f32 %v4321_v26, %v1698_v44  ;;  %1988 = vadd.xlane.f32.xlu1 %v1704_v37  ;;  %v1924_v61 = vmul.f32 1.442695, %v1704_v37 }
 0x45a   : > { %1986 = vadd.xlane.f32.xlu0 %v1699_v45  ;;  %v1922_v36 = vmul.f32 1.442695, %v1699_v45  ;;  %3121 = vpow2.f32 %v1924_v61 }
 0x45c   : > { %3123 = vpow2.f32 %v1922_v36 }
 0x45d   : > { %v2753_v47 = vpop.f32.mrf.mxu1 }
 0x45e   : > { %v1714_v50 = vadd.f32 %v2753_v47, %v4321_v26 }
 0x45f   : > { %v1708_v51 = vpop.f32.mrf.mxu1  ;;  %v3118_v9 = vpop.eup %3117 }
 0x460   : > { %v1709_v57 = vadd.f32 %v4321_v26, %v1708_v51  ;;  %1992 = vadd.xlane.f32.xlu1 %v1714_v50  ;;  %v1928_v48 = vmul.f32 1.442695, %v1714_v50  ;;  %v1951_v20 = vmul.f32 %v3149_v19, %v3118_v9  ;;  %v3153_v50 = vld [vmem:[%s3789_s14 + $0x50] sm:$0xff] }
 0x461   : > { %v3120_v11 = vpop.eup %3119 }
 0x462   : > { %1990 = vadd.xlane.f32.xlu0 %v1709_v57  ;;  %v1926_v3 = vmul.f32 1.442695, %v1709_v57  ;;  %3125 = vpow2.f32 %v1928_v48  ;;  %v1950_v23 = vmul.f32 %v3150_v22, %v3120_v11 }
 0x464   : > { %3127 = vpow2.f32 %v1926_v3  ;;  %v3156_v3 = vld [vmem:[%s3789_s14 + $0x60] sm:$0xff] }
 0x465   : > { %v2756_v58 = vpop.f32.mrf.mxu1 }
 0x466   : > { %v1724_v60 = vadd.f32 %v2756_v58, %v4321_v26 }
 0x467   : > { %v1718_v62 = vpop.f32.mrf.mxu1  ;;  %v3122_v16 = vpop.eup %3121 }
 0x468   : > { %v1719_v0 = vadd.f32 %v4321_v26, %v1718_v62  ;;  %1996 = vadd.xlane.f32.xlu1 %v1724_v60  ;;  %v1932_v63 = vmul.f32 1.442695, %v1724_v60  ;;  %v1953_v31 = vmul.f32 %v3151_v30, %v3122_v16 }
 0x469   : > { %v3124_v24 = vpop.eup %3123 }
 0x46a   : > { %1994 = vadd.xlane.f32.xlu0 %v1719_v0  ;;  %v1930_v39 = vmul.f32 1.442695, %v1719_v0  ;;  %3129 = vpow2.f32 %v1932_v63  ;;  %v1952_v41 = vmul.f32 %v3152_v35, %v3124_v24 }
 0x46c   : > { %3131 = vpow2.f32 %v1930_v39 }
 0x46d   : > { %v2759_v1 = vpop.f32.mrf.mxu1 }
 0x46e   : > { %v1734_v38 = vadd.f32 %v2759_v1, %v4321_v26  ;;  %v3154_v1 = vld [vmem:[%s3789_s14 + $0x40] sm:$0xff] }
 0x46f   : > { %v1728_v2 = vpop.f32.mrf.mxu1  ;;  %v3126_v32 = vpop.eup %3125 }
 0x470   : > { %v1729_v5 = vadd.f32 %v4321_v26, %v1728_v2  ;;  %2000 = vadd.xlane.f32.xlu1 %v1734_v38  ;;  %v1936_v10 = vmul.f32 1.442695, %v1734_v38  ;;  %v1955_v51 = vmul.f32 %v3153_v50, %v3126_v32 }
 0x471   : > { %v3128_v42 = vpop.eup %3127 }
 0x472   : > { %1998 = vadd.xlane.f32.xlu0 %v1729_v5  ;;  %v1934_v13 = vmul.f32 1.442695, %v1729_v5  ;;  %3133 = vpow2.f32 %v1936_v10  ;;  %v1954_v38 = vmul.f32 %v3154_v1, %v3128_v42  ;;  %v3157_v10 = vld [vmem:[%s3789_s14 + $0x90] sm:$0xff]  ;;  %v3162_v42 = vld [vmem:[%s3789_s14 + $0xc0] sm:$0xff] }
 0x474   : > { %3135 = vpow2.f32 %v1934_v13 }
 0x475   : > { %v2762_v40 = vpop.f32.mrf.mxu1 }
 0x476   : > { %v1744_v49 = vadd.f32 %v2762_v40, %v4321_v26 }
 0x477   : > { %v1738_v6 = vpop.f32.mrf.mxu1  ;;  %v3130_v62 = vpop.eup %3129 }
 0x478   : > { %v1739_v56 = vadd.f32 %v4321_v26, %v1738_v6  ;;  %2004 = vadd.xlane.f32.xlu1 %v1744_v49  ;;  %v1940_v17 = vmul.f32 1.442695, %v1744_v49 }
 0x479   : > { %v3132_v43 = vpop.eup %3131 }
 0x47a   : > { %2002 = vadd.xlane.f32.xlu0 %v1739_v56  ;;  %v1938_v25 = vmul.f32 1.442695, %v1739_v56  ;;  %3137 = vpow2.f32 %v1940_v17  ;;  %v3155_v56 = vld [vmem:[%s3789_s14 + $0x70] sm:$0xff] }
 0x47b   : > { %v1957_v61 = vmul.f32 %v3155_v56, %v3130_v62 }
 0x47c   : > { %3139 = vpow2.f32 %v1938_v25 }
 0x47d   : > { %v2765_v53 = vpop.f32.mrf.mxu1 }
 0x47e   : > { %v1754_v8 = vadd.f32 %v2765_v53, %v4321_v26 }
 0x47f   : > { %v1748_v55 = vpop.f32.mrf.mxu1  ;;  %v3134_v36 = vpop.eup %3133 }
 0x480   : > { %v1749_v59 = vadd.f32 %v4321_v26, %v1748_v55  ;;  %2008 = vadd.xlane.f32.xlu1 %v1754_v8  ;;  %v1944_v33 = vmul.f32 1.442695, %v1754_v8  ;;  %v1956_v55 = vmul.f32 %v3156_v3, %v3132_v43 }
 0x482   : > { %2006 = vadd.xlane.f32.xlu0 %v1749_v59  ;;  %v1942_v37 = vmul.f32 1.442695, %v1749_v59  ;;  %3141 = vpow2.f32 %v1944_v33  ;;  %v3136_v59 = vpop.eup %3135  ;;  %v3161_v33 = vld [vmem:[%s3789_s14 + $0xd0] sm:$0xff] }
 0x484   : > { %3143 = vpow2.f32 %v1942_v37 }
 0x485   : > { %v2768_v4 = vpop.f32.mrf.mxu1 }
 0x486   : > { %v1764_v46 = vadd.f32 %v2768_v4, %v4321_v26 }
 0x487   : > { %v1758_v7 = vpop.f32.mrf.mxu1  ;;  %v3138_v9 = vpop.eup %3137 }
 0x488   : > { %v1759_v14 = vadd.f32 %v4321_v26, %v1758_v7  ;;  %2012 = vadd.xlane.f32.xlu1 %v1764_v46  ;;  %v1948_v57 = vmul.f32 1.442695, %v1764_v46  ;;  %v1959_v46 = vmul.f32 %v3157_v10, %v3134_v36 }
 0x489   : > { %v2803_v15 = vpop.f32.mrf.mxu1  ;;  %v3140_v16 = vpop.eup %3139 }
 0x48a   : > { %v1845_v18 = vadd.f32 %v2803_v15, %v4339_v12  ;;  %2010 = vadd.xlane.f32.xlu0 %v1759_v14  ;;  %v1946_v2 = vmul.f32 1.442695, %v1759_v14  ;;  %3145 = vpow2.f32 %v1948_v57  ;;  %v3158_v14 = vld [vmem:[%s3789_s14 + $0x80] sm:$0xff] }
 0x48b   : > { %v1839_v21 = vpop.f32.mrf.mxu1  ;;  %v1958_v15 = vmul.f32 %v3158_v14, %v3136_v59 }
 0x48c   : > { %v1967_v27 = vadd.f32 %v1951_v20, %v1845_v18  ;;  %v1840_v28 = vadd.f32 %v4339_v12, %v1839_v21  ;;  %3147 = vpow2.f32 %v1946_v2  ;;  %v3159_v20 = vld [vmem:[%s3789_s14 + $0xb0] sm:$0xff] }
 0x48d   : > { %v2806_v29 = vpop.f32.mrf.mxu1  ;;  %v1961_v21 = vmul.f32 %v3159_v20, %v3138_v9 }
 0x48e   : > { %2015 = vst [vmem:[%s3789_s14 + $0x10] sm:$0xff] %v1967_v27  ;;  %v1966_v26 = vadd.f32 %v1950_v23, %v1840_v28  ;;  %v1855_v54 = vadd.f32 %v2806_v29, %v4339_v12  ;;  %v3160_v27 = vld [vmem:[%s3789_s14 + $0xa0] sm:$0xff] }
 0x48f   : > { %v1849_v34 = vpop.f32.mrf.mxu1  ;;  %v3142_v22 = vpop.eup %3141  ;;  %v1960_v28 = vmul.f32 %v3160_v27, %v3140_v16 }
 0x490   : > { %2014 = vst [vmem:[%s3789_s14] sm:$0xff] %v1966_v26  ;;  %v1969_v44 = vadd.f32 %v1953_v31, %v1855_v54  ;;  %v1850_v45 = vadd.f32 %v4339_v12, %v1849_v34  ;;  %v1963_v26 = vmul.f32 %v3161_v33, %v3142_v22 }
 0x491   : > { %v2809_v47 = vpop.f32.mrf.mxu1  ;;  %v3144_v29 = vpop.eup %3143 }
 0x492   : > { %2017 = vst [vmem:[%s3789_s14 + $0x30] sm:$0xff] %v1969_v44  ;;  %v1968_v58 = vadd.f32 %v1952_v41, %v1850_v45  ;;  %v1865_v60 = vadd.f32 %v2809_v47, %v4339_v12  ;;  %v1962_v37 = vmul.f32 %v3162_v42, %v3144_v29 }
 0x493   : > { %v1859_v0 = vpop.f32.mrf.mxu1 }
 0x494   : > { %2016 = vst [vmem:[%s3789_s14 + $0x20] sm:$0xff] %v1968_v58  ;;  %v1971_v5 = vadd.f32 %v1955_v51, %v1865_v60  ;;  %v1860_v40 = vadd.f32 %v4339_v12, %v1859_v0  ;;  %v3163_v51 = vld [vmem:[%s3789_s14 + $0xf0] sm:$0xff]  ;;  %v3164_v0 = vld [vmem:[%s3789_s14 + $0xe0] sm:$0xff] }
 0x495   : > { %v2812_v49 = vpop.f32.mrf.mxu1 }
 0x496   : > { %2019 = vst [vmem:[%s3789_s14 + $0x50] sm:$0xff] %v1971_v5  ;;  %v1970_v52 = vadd.f32 %v1954_v38, %v1860_v40  ;;  %v1875_v6 = vadd.f32 %v2812_v49, %v4339_v12 }
 0x497   : > { %v1869_v48 = vpop.f32.mrf.mxu1  ;;  %v3146_v54 = vpop.eup %3145 }
 0x498   : > { %2018 = vst [vmem:[%s3789_s14 + $0x40] sm:$0xff] %v1970_v52  ;;  %v1973_v53 = vadd.f32 %v1957_v61, %v1875_v6  ;;  %v1870_v8 = vadd.f32 %v4339_v12, %v1869_v48  ;;  %v1965_v57 = vmul.f32 %v3163_v51, %v3146_v54 }
 0x499   : > { %v2815_v63 = vpop.f32.mrf.mxu1  ;;  %v3148_v44 = vpop.eup %3147 }
 0x49a   : > { %2021 = vst [vmem:[%s3789_s14 + $0x70] sm:$0xff] %v1973_v53  ;;  %v1972_v39 = vadd.f32 %v1956_v55, %v1870_v8  ;;  %v1885_v4 = vadd.f32 %v2815_v63, %v4339_v12  ;;  %v1964_v1 = vmul.f32 %v3164_v0, %v3148_v44 }
 0x49b   : > { %v1879_v7 = vpop.f32.mrf.mxu1 }
 0x49c   : > { %2020 = vst [vmem:[%s3789_s14 + $0x60] sm:$0xff] %v1972_v39  ;;  %v1975_v11 = vadd.f32 %v1959_v46, %v1885_v4  ;;  %v1880_v13 = vadd.f32 %v4339_v12, %v1879_v7 }
 0x49d   : > { %v2818_v17 = vpop.f32.mrf.mxu1 }
 0x49e   : > { %2023 = vst [vmem:[%s3789_s14 + $0x90] sm:$0xff] %v1975_v11  ;;  %v1974_v18 = vadd.f32 %v1958_v15, %v1880_v13  ;;  %v1895_v19 = vadd.f32 %v2818_v17, %v4339_v12 }
 0x49f   : > { %v1889_v23 = vpop.f32.mrf.mxu1 }
 0x4a0   : > { %2022 = vst [vmem:[%s3789_s14 + $0x80] sm:$0xff] %v1974_v18  ;;  %v1977_v24 = vadd.f32 %v1961_v21, %v1895_v19  ;;  %v1890_v25 = vadd.f32 %v4339_v12, %v1889_v23 }
 0x4a1   : > { %v2821_v30 = vpop.f32.mrf.mxu1 }
 0x4a2   : > { %2025 = vst [vmem:[%s3789_s14 + $0xb0] sm:$0xff] %v1977_v24  ;;  %v1976_v31 = vadd.f32 %v1960_v28, %v1890_v25  ;;  %v1905_v32 = vadd.f32 %v2821_v30, %v4339_v12 }
 0x4a3   : > { %v1899_v34 = vpop.f32.mrf.mxu1 }
 0x4a4   : > { %2024 = vst [vmem:[%s3789_s14 + $0xa0] sm:$0xff] %v1976_v31  ;;  %v1979_v35 = vadd.f32 %v1963_v26, %v1905_v32  ;;  %v1900_v41 = vadd.f32 %v4339_v12, %v1899_v34 }
 0x4a5   : > { %v2824_v45 = vpop.f32.mrf.mxu1 }
 0x4a6   : > { %2027 = vst [vmem:[%s3789_s14 + $0xd0] sm:$0xff] %v1979_v35  ;;  %v1978_v47 = vadd.f32 %v1962_v37, %v1900_v41  ;;  %v1915_v50 = vadd.f32 %v2824_v45, %v4339_v12 }
 0x4a7   : > { %v1909_v58 = vpop.f32.mrf.mxu1 }
 0x4a8   : > { %2026 = vst [vmem:[%s3789_s14 + $0xc0] sm:$0xff] %v1978_v47  ;;  %v1981_v60 = vadd.f32 %v1965_v57, %v1915_v50  ;;  %v1910_v62 = vadd.f32 %v4339_v12, %v1909_v58 }
 0x4aa   : > { %2029 = vst [vmem:[%s3789_s14 + $0xf0] sm:$0xff] %v1981_v60  ;;  %v1980_v38 = vadd.f32 %v1964_v1, %v1910_v62 }
 0x4ac   : > { %2028 = vst [vmem:[%s3789_s14 + $0xe0] sm:$0xff] %v1980_v38 }
 0x4ad   : > { %3318 = shalt.err (!%p3315_p13)
}
 0x4ae   : > { %s3319_s24 = scalar_lea.hbm %s4393_s0, 4096  ;;  %s3323_s19 = scalar_lea.hbm %s4593_s7, 8192 }
 0x4af   : > { %p3320_p4 = scmp.ne.s32.totalorder %s4393_s0, %s3319_s24  ;;  %p3324_p7 = scmp.lt.s32.totalorder %s4393_s0, %s4593_s7 }
 0x4b0   : > { %p3325_p11 = scmp.lt.s32.totalorder %s3323_s19, %s3319_s24 }
 0x4b1   : > { %p3321_p6 = pnand %p3320_p4, %p3678_p0 }
 0x4b2   : > { %p3326_p1 = por %p3325_p11, %p3324_p7 }
 0x4b3   : > { %p3322_p12 = pneg %p3321_p6 }
 0x4b5   : > { %p3327_p2 = pnand %p3326_p1, %p3322_p12 }
 0x4b7   : > { %3330 = shalt.err (!%p3327_p2)
}
 0x4b8   : > { %s3449_s6 = smov 256   ;;  %s3450_s26 = smov 16   ;;  %v1314_v12 = vpop.xlane.xlu1 %1313  ;;  %v1310_v2 = vpop.xlane.xlu0 %1309  ;;  %v2047_v3 = vld [vmem:[%s3783_s29 + $0x8] sm:$0xff]  ;;  %v2046_v59 = vld [vmem:[%s3783_s29] sm:$0xff]  ;;  %vm2094_vm1 = vcmask 7168   ;;  %v2049_v11 = vld [vmem:[%s3783_s29 + $0x18] sm:$0xff] }
 0x4b9   : > { %2835 = dma.vmem_to_hbm [thread:$0]  (%p3678_p0), %s4395_s20, 4096, %s4393_s0, %s2112_s1, %s3449_s6, %s3449_s6, %s3450_s26   ;;  %v2063_v39 = vadd.f32 %v2047_v3, %v1310_v2  ;;  %v2065_v14 = vadd.f32 %v2049_v11, %v1314_v12 }
 0x4ba   : > { %v2048_v13 = vld [vmem:[%s3783_s29 + $0x10] sm:$0xff]  ;;  %v2051_v20 = vld [vmem:[%s3783_s29 + $0x28] sm:$0xff]  ;;  %v2050_v21 = vld [vmem:[%s3783_s29 + $0x20] sm:$0xff] }
 0x4bb   : > { %v2053_v29 = vld [vmem:[%s3783_s29 + $0x38] sm:$0xff]  ;;  %v2052_v30 = vld [vmem:[%s3783_s29 + $0x30] sm:$0xff]  ;;  %v2055_v35 = vld [vmem:[%s3783_s29 + $0x48] sm:$0xff] }
 0x4bc   : > { %v1312_v5 = vpop.xlane.xlu1 %1311  ;;  %v1308_v40 = vpop.xlane.xlu0 %1307  ;;  %v2054_v41 = vld [vmem:[%s3783_s29 + $0x40] sm:$0xff]  ;;  %v2057_v51 = vld [vmem:[%s3783_s29 + $0x58] sm:$0xff]  ;;  %v2056_v57 = vld [vmem:[%s3783_s29 + $0x50] sm:$0xff] }
 0x4bd   : > { %v2062_v10 = vadd.f32 %v2046_v59, %v1308_v40  ;;  %v2064_v16 = vadd.f32 %v2048_v13, %v1312_v5  ;;  %v2059_v12 = vld [vmem:[%s3783_s29 + $0x68] sm:$0xff]  ;;  %v2058_v2 = vld [vmem:[%s3783_s29 + $0x60] sm:$0xff] }
 0x4c0   : > { %v1318_v43 = vpop.xlane.xlu1 %1317  ;;  %v1316_v49 = vpop.xlane.xlu0 %1315 }
 0x4c1   : > { %v2067_v22 = vadd.f32 %v2051_v20, %v1318_v43  ;;  %v2066_v24 = vadd.f32 %v2050_v21, %v1316_v49 }
 0x4c4   : > { %v1322_v52 = vpop.xlane.xlu1 %1321  ;;  %v1320_v6 = vpop.xlane.xlu0 %1319 }
 0x4c5   : > { %v2069_v31 = vadd.f32 %v2053_v29, %v1322_v52  ;;  %v2068_v33 = vadd.f32 %v2052_v30, %v1320_v6 }
 0x4c8   : > { %v1326_v56 = vpop.xlane.xlu1 %1325  ;;  %v1324_v61 = vpop.xlane.xlu0 %1323 }
 0x4c9   : > { %v2071_v42 = vadd.f32 %v2055_v35, %v1326_v56  ;;  %v2070_v44 = vadd.f32 %v2054_v41, %v1324_v61  ;;  %v2061_v56 = vld [vmem:[%s3783_s29 + $0x78] sm:$0xff]  ;;  %v2060_v61 = vld [vmem:[%s3783_s29 + $0x70] sm:$0xff] }
 0x4cc   : > { %v1330_v36 = vpop.xlane.xlu1 %1329  ;;  %v1328_v48 = vpop.xlane.xlu0 %1327 }
 0x4cd   : > { %v2073_v58 = vadd.f32 %v2057_v51, %v1330_v36  ;;  %v2072_v62 = vadd.f32 %v2056_v57, %v1328_v48 }
 0x4d0   : > { %v4422_v53 = vpop.xlane.xlu1 %1333  ;;  %v4424_v8 = vpop.xlane.xlu0 %1331 }
 0x4d1   : > { %v2075_v5 = vadd.f32 %v2059_v12, %v4422_v53  ;;  %v2074_v43 = vadd.f32 %v2058_v2, %v4424_v8 }
 0x4d4   : > { %v4427_v55 = vpop.xlane.xlu1 %1337  ;;  %v4430_v63 = vpop.xlane.xlu0 %1335 }
 0x4d5   : > { %v2077_v36 = vadd.f32 %v2061_v56, %v4427_v55  ;;  %v2076_v3 = vadd.f32 %v2060_v61, %v4430_v63 }
 0x4d9   : > { %v1985_v4 = vpop.xlane.xlu1 %1984 }
 0x4da   : > { %v2079_v46 = vadd.f32 %v2063_v39, %v1985_v4 }
 0x4db   : > { %v1983_v9 = vpop.xlane.xlu0 %1982 }
 0x4dc   : > { %2096 = vst.msk [vmem:[%s3783_s29 + $0x8] sm:$0xff] %vm2094_vm1, %v2079_v46  ;;  %v2078_v7 = vadd.f32 %v2062_v10, %v1983_v9 }
 0x4de   : > { %2095 = vst.msk [vmem:[%s3783_s29] sm:$0xff] %vm2094_vm1, %v2078_v7 }
 0x4e1   : > { %v1989_v15 = vpop.xlane.xlu1 %1988 }
 0x4e2   : > { %v2081_v17 = vadd.f32 %v2065_v14, %v1989_v15 }
 0x4e3   : > { %v1987_v18 = vpop.xlane.xlu0 %1986 }
 0x4e4   : > { %2098 = vst.msk [vmem:[%s3783_s29 + $0x18] sm:$0xff] %vm2094_vm1, %v2081_v17  ;;  %v2080_v19 = vadd.f32 %v2064_v16, %v1987_v18 }
 0x4e6   : > { %2097 = vst.msk [vmem:[%s3783_s29 + $0x10] sm:$0xff] %vm2094_vm1, %v2080_v19 }
 0x4e9   : > { %v1993_v23 = vpop.xlane.xlu1 %1992 }
 0x4ea   : > { %v2083_v25 = vadd.f32 %v2067_v22, %v1993_v23 }
 0x4eb   : > { %v1991_v27 = vpop.xlane.xlu0 %1990 }
 0x4ec   : > { %2100 = vst.msk [vmem:[%s3783_s29 + $0x28] sm:$0xff] %vm2094_vm1, %v2083_v25  ;;  %v2082_v28 = vadd.f32 %v2066_v24, %v1991_v27 }
 0x4ee   : > { %2099 = vst.msk [vmem:[%s3783_s29 + $0x20] sm:$0xff] %vm2094_vm1, %v2082_v28 }
 0x4f1   : > { %v1997_v32 = vpop.xlane.xlu1 %1996 }
 0x4f2   : > { %v2085_v26 = vadd.f32 %v2069_v31, %v1997_v32 }
 0x4f3   : > { %v1995_v54 = vpop.xlane.xlu0 %1994 }
 0x4f4   : > { %2102 = vst.msk [vmem:[%s3783_s29 + $0x38] sm:$0xff] %vm2094_vm1, %v2085_v26  ;;  %v2084_v34 = vadd.f32 %v2068_v33, %v1995_v54 }
 0x4f6   : > { %2101 = vst.msk [vmem:[%s3783_s29 + $0x30] sm:$0xff] %vm2094_vm1, %v2084_v34 }
 0x4f9   : > { %v2001_v37 = vpop.xlane.xlu1 %2000 }
 0x4fa   : > { %v2087_v45 = vadd.f32 %v2071_v42, %v2001_v37 }
 0x4fb   : > { %v1999_v47 = vpop.xlane.xlu0 %1998 }
 0x4fc   : > { %2104 = vst.msk [vmem:[%s3783_s29 + $0x48] sm:$0xff] %vm2094_vm1, %v2087_v45  ;;  %v2086_v50 = vadd.f32 %v2070_v44, %v1999_v47 }
 0x4fe   : > { %2103 = vst.msk [vmem:[%s3783_s29 + $0x40] sm:$0xff] %vm2094_vm1, %v2086_v50 }
 0x501   : > { %v2005_v60 = vpop.xlane.xlu1 %2004 }
 0x502   : > { %v2089_v0 = vadd.f32 %v2073_v58, %v2005_v60 }
 0x503   : > { %v2003_v1 = vpop.xlane.xlu0 %2002 }
 0x504   : > { %2106 = vst.msk [vmem:[%s3783_s29 + $0x58] sm:$0xff] %vm2094_vm1, %v2089_v0  ;;  %v2088_v38 = vadd.f32 %v2072_v62, %v2003_v1 }
 0x506   : > { %2105 = vst.msk [vmem:[%s3783_s29 + $0x50] sm:$0xff] %vm2094_vm1, %v2088_v38 }
 0x509   : > { %v2009_v40 = vpop.xlane.xlu1 %2008 }
 0x50a   : > { %v2091_v49 = vadd.f32 %v2075_v5, %v2009_v40 }
 0x50b   : > { %v2007_v52 = vpop.xlane.xlu0 %2006 }
 0x50c   : > { %2108 = vst.msk [vmem:[%s3783_s29 + $0x68] sm:$0xff] %vm2094_vm1, %v2091_v49  ;;  %v2090_v6 = vadd.f32 %v2074_v43, %v2007_v52 }
 0x50e   : > { %2107 = vst.msk [vmem:[%s3783_s29 + $0x60] sm:$0xff] %vm2094_vm1, %v2090_v6 }
 0x511   : > { %v2013_v48 = vpop.xlane.xlu1 %2012 }
 0x512   : > { %v2093_v59 = vadd.f32 %v2077_v36, %v2013_v48 }
 0x513   : > { %v2011_v53 = vpop.xlane.xlu0 %2010 }
 0x514   : > { %2110 = vst.msk [vmem:[%s3783_s29 + $0x78] sm:$0xff] %vm2094_vm1, %v2093_v59  ;;  %v2092_v39 = vadd.f32 %v2076_v3, %v2011_v53 }
 0x516   : > { %2109 = vst.msk [vmem:[%s3783_s29 + $0x70] sm:$0xff] %vm2094_vm1, %v2092_v39 }
 0x517 PF: > { %p2858_p0 = scmp.ge.s32.totalorder %s3433_s15, 2  ;;  %s2150_s10 = sand.u32 1, %s3405_s30  }
 0x518   : > { %p4594_p8 = scmp.ne.s32.totalorder %s4575_s3, 0  ;;  %s2151_s17 = scalar_lea.sflag [#allocation4], %s2150_s10 }
 0x51a   : > { %p2854_p3 = pnand %p2858_p0, %p4594_p8 }
 0x51c   : > { %p2855_p5 = pneg %p2854_p3 }
 0x51e   : > { %3388 = dma.done.wait (%p2855_p5), %s2151_s17, 4096  }
 0x51f   : > { %3390 = vsyncadd (%p2855_p5), %s2151_s17, 4294963200  ;;  %s31_s15 = sadd.s32 1, %s3433_s15   ;;  %s4595_s27 = sld [smem:[#allocation16_spill]] }
 0x520   : > { %p28_p10 = scmp.ge.s32.totalorder %s31_s15, 6   ;;  %s4596_s28 = sld [smem:[#allocation17_spill]] }
 0x521   : > { %s4597_s29 = sld [smem:[#allocation23_spill]]  ;;  %s4603_s30 = smov %s3409_s9 }
 0x522   : > { %s4598_s14 = sld [smem:[#allocation18_spill]]  ;;  %s4605_s11 = smov %s3425_s13 }
 0x523   : > { %s4599_s10 = sld [smem:[#allocation26_spill]] }
 0x524   : > { %s4600_s12 = sld [smem:[#allocation21_spill]] }
 0x525   : > { %s4601_s18 = sld [smem:[#allocation22_spill]] }
 0x526   : > { %s4602_s4 = sld [smem:[#allocation24_spill]] }
 0x528   : > { %s4604_s9 = smov %s4598_s14  ;;  %30 = sbr.rel (!%p28_p10) target bundleno = 22 (0x16), region = 169 }
 0x52b   : > { %s4606_s13 = smov %s4601_s18 }
 0x52c   : > { %s4607_s14 = smov %s4602_s4 }
 0x52d   :  { %2164 = vsyncpa [#allocation3], 1 }
 0x52e   :  { %2166 = vsyncpa [#allocation3 + $0x1], 1 }
 0x52f   :  { %2167 = vsyncpa [#allocation6], 1 }
 0x530   :  { %2169 = vsyncpa [#allocation6 + $0x1], 1 }
 0x531   :  { %2170 = vsyncpa [#allocation9], 1 }
 0x532   :  { %2172 = vsyncpa [#allocation9 + $0x1], 1 }
 0x533   :  { %2173 = vsyncpa [#allocation4], 1 }
 0x534   :  { %2175 = vsyncpa [#allocation4 + $0x1], 1 }

</bundles_post_ra>
